<compile_context>
chip_gen: v7x
topology: tpu7x:2x2x1
jax: 0.10.0
libtpu: 0.0.40
codegen_flags: <defaults>
</compile_context>

<pallas_src>
import functools

import jax
import jax.numpy as jnp
from jax import lax
from jax.experimental import pallas as pl
from jax.experimental.pallas import tpu as pltpu

EPS = 1e-5
LANE = 128


def _rpad(c):
    return ((c + LANE - 1) // LANE) * LANE


# ----------------------------- Pallas kernels -----------------------------

def _conv_stats_kernel(x_ref, w_ref, b_ref, z_ref, st_ref, *, taps, Ho, Wo, cpi):
    """One image: 3x3 conv as a single big-K matmul + BN partial stats.

    x_ref : (1, Hb, Wb, Cl)  bf16 padded image (space-to-depth if stride=2)
    w_ref : (9*cpi, cpo)     bf16 flattened conv weight
    b_ref : (1, cpo)         f32 bias
    z_ref : (Ho*Wo, cpo)     f32 conv output rows of this image
    st_ref: (1, 8, cpo)      f32 partials: row0 = sum, row1 = sum of squares
    """
    x = x_ref[0]                                        # (Hb, Wb, Cl) bf16
    cols = []
    for (ro, co, lo) in taps:                           # 9 static shifted views
        t = x[ro:ro + Ho, co:co + Wo, lo:lo + cpi]      # (Ho, Wo, cpi)
        cols.append(t.reshape(Ho * Wo, cpi))
    big = jnp.concatenate(cols, axis=-1)                # (Ho*Wo, 9*cpi) bf16
    z = jnp.dot(big, w_ref[...], preferred_element_type=jnp.float32)
    z = z + b_ref[...]
    z_ref[...] = z

    cpo = z.shape[-1]
    s1 = jnp.sum(z, axis=0, keepdims=True)              # (1, cpo)
    s2 = jnp.sum(z * z, axis=0, keepdims=True)
    st_ref[0] = jnp.concatenate(
        [s1, s2, jnp.zeros((6, cpo), jnp.float32)], axis=0)


def _bn_from_partials(z, st, g, be, inv_count):
    """Normalize with global batch statistics reduced from per-image partials."""
    ssum = jnp.sum(st[:, 0:1, :], axis=0)               # (1, cpo)
    ssq = jnp.sum(st[:, 1:2, :], axis=0)                # (1, cpo)
    mean = ssum * inv_count
    var = ssq * inv_count - mean * mean
    return (z - mean) * lax.rsqrt(var + EPS) * g + be


def _bn_relu_kernel(z_ref, st_ref, g_ref, be_ref, o_ref, *, inv_count):
    y = _bn_from_partials(z_ref[...], st_ref[...], g_ref[...], be_ref[...],
                          inv_count)
    o_ref[...] = jnp.maximum(y, 0.0).astype(o_ref.dtype)


def _bn_add_relu_kernel(z_ref, st_ref, g_ref, be_ref, skip_ref, o_ref, *,
                        inv_count):
    y = _bn_from_partials(z_ref[...], st_ref[...], g_ref[...], be_ref[...],
                          inv_count)
    o_ref[...] = jnp.maximum(y + skip_ref[...], 0.0).astype(o_ref.dtype)


def _bn_proj_relu_kernel(z_ref, st_ref, g_ref, be_ref, xs_ref, w3_ref, b3_ref,
                         o_ref, *, inv_count):
    y = _bn_from_partials(z_ref[...], st_ref[...], g_ref[...], be_ref[...],
                          inv_count)
    skip = jnp.dot(xs_ref[...], w3_ref[...],
                   preferred_element_type=jnp.float32) + b3_ref[...]
    o_ref[...] = jnp.maximum(y + skip, 0.0).astype(o_ref.dtype)


# ------------------------------ JAX glue ----------------------------------

def _conv_input(x, stride, Ho, Wo):
    """Prepare the per-image conv input and the 9 static tap offsets.

    x: (N, H, W, Cp) channel-padded activation.  Returns (xin, (Hb,Wb,Cl),
    taps) where tap k = 3*kh+kw of the 3x3/pad-1 conv equals
    xin[n, ro:ro+Ho, co:co+Wo, lo:lo+Cp] with (ro,co,lo) = taps[k].
    """
    N, H, W, Cp = x.shape
    xp = jnp.pad(x, ((0, 0), (1, 1), (1, 1), (0, 0)))
    if stride == 1:
        taps = [(kh, kw, 0) for kh in range(3) for kw in range(3)]
        return xp, (H + 2, W + 2, Cp), taps
    # stride == 2: space-to-depth (1x reorg) so tap slices stay unit-stride.
    Hp, Wp = H + 2, W + 2
    xp = jnp.pad(xp, ((0, 0), (0, Hp % 2), (0, Wp % 2), (0, 0)))
    Hb, Wb = (Hp + 1) // 2, (Wp + 1) // 2
    xin = xp.reshape(N, Hb, 2, Wb, 2, Cp).transpose(0, 1, 3, 2, 4, 5)
    xin = xin.reshape(N, Hb, Wb, 4 * Cp)
    taps = [(kh // 2, kw // 2, (2 * (kh % 2) + (kw % 2)) * Cp)
            for kh in range(3) for kw in range(3)]
    return xin, (Hb, Wb, 4 * Cp), taps


def _prep_conv_w(w_hwio, b, cpi, cpo):
    ci, co = w_hwio.shape[2], w_hwio.shape[3]
    w = jnp.zeros((3, 3, cpi, cpo), jnp.float32).at[:, :, :ci, :co].set(w_hwio)
    bp = jnp.zeros((1, cpo), jnp.float32).at[:, :co].set(b.reshape(1, -1))
    return w.reshape(9 * cpi, cpo).astype(jnp.bfloat16), bp


def _pad_vec(v, cpo):
    return jnp.zeros((1, cpo), jnp.float32).at[:, :v.shape[-1]].set(
        v.reshape(1, -1))


def _conv_pass(xin, dims, taps, wflat, bias, N, Ho, Wo, cpi, cpo):
    Hb, Wb, Cl = dims
    rows = Ho * Wo
    M = N * rows
    kern = functools.partial(_conv_stats_kernel, taps=tuple(taps),
                             Ho=Ho, Wo=Wo, cpi=cpi)
    cost = pl.CostEstimate(
        flops=2 * M * 9 * cpi * cpo,
        transcendentals=0,
        bytes_accessed=int(xin.size) * 2 + 9 * cpi * cpo * 2
                       + M * cpo * 4 + N * 8 * cpo * 4)
    return pl.pallas_call(
        kern,
        grid=(N,),
        in_specs=[pl.BlockSpec((1, Hb, Wb, Cl), lambda n: (n, 0, 0, 0)),
                  pl.BlockSpec((9 * cpi, cpo), lambda n: (0, 0)),
                  pl.BlockSpec((1, cpo), lambda n: (0, 0))],
        out_specs=[pl.BlockSpec((rows, cpo), lambda n: (n, 0)),
                   pl.BlockSpec((1, 8, cpo), lambda n: (n, 0, 0))],
        out_shape=[jax.ShapeDtypeStruct((M, cpo), jnp.float32),
                   jax.ShapeDtypeStruct((N, 8, cpo), jnp.float32)],
        compiler_params=pltpu.CompilerParams(
            dimension_semantics=("parallel",)),
        cost_estimate=cost,
    )(xin, wflat, bias)


def _bn_pass(kern, inputs, in_specs, out_dtype, N, rows, cpo, extra_flops=0):
    cost = pl.CostEstimate(
        flops=10 * N * rows * cpo + extra_flops,
        transcendentals=N * cpo,
        bytes_accessed=sum(int(a.size) * a.dtype.itemsize for a in inputs)
                       + N * rows * cpo * jnp.dtype(out_dtype).itemsize)
    return pl.pallas_call(
        kern,
        grid=(N,),
        in_specs=in_specs,
        out_specs=pl.BlockSpec((rows, cpo), lambda n: (n, 0)),
        out_shape=jax.ShapeDtypeStruct((N * rows, cpo), out_dtype),
        compiler_params=pltpu.CompilerParams(
            dimension_semantics=("parallel",)),
        cost_estimate=cost,
    )(*inputs)


def residual_forward(x_nchw, params, *, use_1x1conv=False, stride=1):
    # TODO(synk): general stride support; d2l Residual only uses stride 1 or 2.
    if stride not in (1, 2):
        raise ValueError("stride must be 1 or 2")
    x = jnp.transpose(x_nchw, (0, 2, 3, 1)).astype(jnp.float32)  # NCHW -> NHWC
    N, H, W, Cin = x.shape
    Cout = params["w1"].shape[-1]
    if not use_1x1conv and (stride != 1 or Cin != Cout):
        raise ValueError("identity skip requires stride == 1 and Cin == Cout")

    cpi, cpo = _rpad(Cin), _rpad(Cout)
    Ho = (H - 1) // stride + 1
    Wo = (W - 1) // stride + 1
    rows = Ho * Wo
    M = N * rows
    inv_m = 1.0 / float(M)

    # channel-pad the input to a lane-dense width
    xc = jnp.zeros((N, H, W, cpi), jnp.float32).at[..., :Cin].set(x)
    xc_bf = xc.astype(jnp.bfloat16)

    # ---- conv1 (3x3, pad 1, stride) -> z1 + BN1 partial stats ----
    xin1, dims1, taps1 = _conv_input(xc_bf, stride, Ho, Wo)
    w1, b1 = _prep_conv_w(params["w1"], params["b1"], cpi, cpo)
    z1, st1 = _conv_pass(xin1, dims1, taps1, w1, b1, N, Ho, Wo, cpi, cpo)

    # ---- bn1 + relu -> y (bf16, re-read as conv2's matmul operand) ----
    g1, be1 = _pad_vec(params["g1"], cpo), _pad_vec(params["be1"], cpo)
    y = _bn_pass(
        functools.partial(_bn_relu_kernel, inv_count=inv_m),
        (z1, st1, g1, be1),
        [pl.BlockSpec((rows, cpo), lambda n: (n, 0)),
         pl.BlockSpec((N, 8, cpo), lambda n: (0, 0, 0)),
         pl.BlockSpec((1, cpo), lambda n: (0, 0)),
         pl.BlockSpec((1, cpo), lambda n: (0, 0))],
        jnp.bfloat16, N, rows, cpo)

    # ---- conv2 (3x3, pad 1, stride 1) -> z2 + BN2 partial stats ----
    y_img = y.reshape(N, Ho, Wo, cpo)
    xin2, dims2, taps2 = _conv_input(y_img, 1, Ho, Wo)
    w2, b2 = _prep_conv_w(params["w2"], params["b2"], cpo, cpo)
    z2, st2 = _conv_pass(xin2, dims2, taps2, w2, b2, N, Ho, Wo, cpo, cpo)

    g2, be2 = _pad_vec(params["g2"], cpo), _pad_vec(params["be2"], cpo)

    # ---- bn2 + skip + relu ----
    if use_1x1conv:
        xs = xc_bf[:, ::stride, ::stride, :].reshape(M, cpi)
        w3 = jnp.zeros((cpi, cpo), jnp.float32
                       ).at[:Cin, :Cout].set(params["w3"]).astype(jnp.bfloat16)
        b3 = _pad_vec(params["b3"], cpo)
        out = _bn_pass(
            functools.partial(_bn_proj_relu_kernel, inv_count=inv_m),
            (z2, st2, g2, be2, xs, w3, b3),
            [pl.BlockSpec((rows, cpo), lambda n: (n, 0)),
             pl.BlockSpec((N, 8, cpo), lambda n: (0, 0, 0)),
             pl.BlockSpec((1, cpo), lambda n: (0, 0)),
             pl.BlockSpec((1, cpo), lambda n: (0, 0)),
             pl.BlockSpec((rows, cpi), lambda n: (n, 0)),
             pl.BlockSpec((cpi, cpo), lambda n: (0, 0)),
             pl.BlockSpec((1, cpo), lambda n: (0, 0))],
            jnp.float32, N, rows, cpo, extra_flops=2 * M * cpi * cpo)
    else:
        skip = xc.reshape(M, cpo)  # stride==1 and cpi==cpo guaranteed above
        out = _bn_pass(
            functools.partial(_bn_add_relu_kernel, inv_count=inv_m),
            (z2, st2, g2, be2, skip),
            [pl.BlockSpec((rows, cpo), lambda n: (n, 0)),
             pl.BlockSpec((N, 8, cpo), lambda n: (0, 0, 0)),
             pl.BlockSpec((1, cpo), lambda n: (0, 0)),
             pl.BlockSpec((1, cpo), lambda n: (0, 0)),
             pl.BlockSpec((rows, cpo), lambda n: (n, 0))],
            jnp.float32, N, rows, cpo)

    out = out.reshape(N, Ho, Wo, cpo)[..., :Cout]
    return jnp.transpose(out, (0, 3, 1, 2))  # NHWC -> NCHW


# ----------------------- deterministic parameter init ---------------------

def init_params(key, in_channels, out_channels, use_1x1conv):
    ks = jax.random.split(key, 10)

    def nrm(k, shape, scale=0.1):
        return scale * jax.random.normal(k, shape, jnp.float32)

    p = {
        "w1": nrm(ks[0], (3, 3, in_channels, out_channels)),   # HWIO
        "b1": nrm(ks[1], (1, out_channels)),
        "g1": 1.0 + nrm(ks[2], (1, out_channels)),
        "be1": nrm(ks[3], (1, out_channels)),
        "w2": nrm(ks[4], (3, 3, out_channels, out_channels)),
        "b2": nrm(ks[5], (1, out_channels)),
        "g2": 1.0 + nrm(ks[6], (1, out_channels)),
        "be2": nrm(ks[7], (1, out_channels)),
    }
    if use_1x1conv:
        p["w3"] = nrm(ks[8], (in_channels, out_channels))
        p["b3"] = nrm(ks[9], (1, out_channels))
    return p


# ----------------------------- pure-JAX reference -------------------------

def residual_reference(x_nchw, params, *, use_1x1conv=False, stride=1):
    x = jnp.transpose(x_nchw, (0, 2, 3, 1)).astype(jnp.float32)
    Cin = x.shape[-1]
    Cout = params["w1"].shape[-1]

    def conv(inp, w_hwio, b, s, pad):
        z = lax.conv_general_dilated(
            inp, w_hwio, (s, s), pad,
            dimension_numbers=("NHWC", "HWIO", "NHWC"),
            precision=lax.Precision.HIGHEST)
        return z + b.reshape(1, 1, 1, -1)

    def bn(z, g, be):
        mean = jnp.mean(z, axis=(0, 1, 2), keepdims=True)
        var = jnp.mean((z - mean) ** 2, axis=(0, 1, 2), keepdims=True)
        return ((z - mean) * lax.rsqrt(var + EPS)
                * g.reshape(1, 1, 1, -1) + be.reshape(1, 1, 1, -1))

    y = jax.nn.relu(bn(conv(x, params["w1"], params["b1"], stride,
                            [(1, 1), (1, 1)]),
                       params["g1"], params["be1"]))
    y = bn(conv(y, params["w2"], params["b2"], 1, [(1, 1), (1, 1)]),
           params["g2"], params["be2"])
    if use_1x1conv:
        skip = conv(x, params["w3"].reshape(1, 1, Cin, Cout), params["b3"],
                    stride, [(0, 0), (0, 0)])
    else:
        skip = x
    out = jax.nn.relu(y + skip)
    return jnp.transpose(out, (0, 3, 1, 2))


# TODO(synk): BatchNorm running_mean/running_var updates (a training-mode side
# effect) are not modeled; only the batch-statistics forward output is
# reproduced.

if __name__ == "__main__":
    key = jax.random.PRNGKey(0)
    kx, kp1, kp2 = jax.random.split(key, 3)

    # PyTorch-style NCHW input.
    x = jax.random.normal(kx, (2, 4, 16, 16), jnp.float32)

    # Tolerances are loosened vs. a pure-f32 reference because matmul operands
    # are intentionally bf16 (f32 accumulation); errors stay well below 5e-2.
    # Config 1: Residual(4, 4) -> identity skip, stride 1.
    p1 = init_params(kp1, 4, 4, use_1x1conv=False)
    out1 = jax.block_until_ready(
        residual_forward(x, p1, use_1x1conv=False, stride=1))
    ref1 = residual_reference(x, p1, use_1x1conv=False, stride=1)
    assert out1.shape == (2, 4, 16, 16)
    assert jnp.allclose(out1, ref1, atol=5e-2, rtol=5e-2)

    # Config 2: Residual(4, 8, use_1x1conv=True, stride=2) -> 1x1 projection.
    p2 = init_params(kp2, 4, 8, use_1x1conv=True)
    out2 = jax.block_until_ready(
        residual_forward(x, p2, use_1x1conv=True, stride=2))
    ref2 = residual_reference(x, p2, use_1x1conv=True, stride=2)
    assert out2.shape == (2, 8, 8, 8)
    assert jnp.allclose(out2, ref2, atol=5e-2, rtol=5e-2)

    print("KERNEL_OK")
</pallas_src>

<mosaic_0001>
module attributes {stable_mosaic.version = 11 : i64} {
  func.func @_conv_stats_kernel(%arg0: i32, %arg1: memref<1x18x18x128xbf16, #tpu.memory_space<vmem>>, %arg2: memref<1152x128xbf16, #tpu.memory_space<vmem>>, %arg3: memref<1x128xf32, #tpu.memory_space<vmem>>, %arg4: memref<256x128xf32, #tpu.memory_space<vmem>>, %arg5: memref<1x8x128xf32, #tpu.memory_space<vmem>>) attributes {dimension_semantics = [#tpu.dimension_semantics<parallel>], iteration_bounds = array<i64: 2>, scalar_prefetch = 0 : i64, scratch_operands = 0 : i64, tpu.core_type = #tpu.core_type<tc>, window_params = [{transform_indices = @transform_0, window_bounds = array<i64: 1, 18, 18, 128>}, {pipeline_mode = #tpu.pipeline_mode<synchronous>, transform_indices = @transform_1, window_bounds = array<i64: 1152, 128>}, {pipeline_mode = #tpu.pipeline_mode<synchronous>, transform_indices = @transform_2, window_bounds = array<i64: 1, 128>}, {transform_indices = @transform_3, window_bounds = array<i64: 256, 128>}, {transform_indices = @transform_4, window_bounds = array<i64: 1, 8, 128>}]} {
    %c0 = arith.constant 0 : index
    %c0_0 = arith.constant 0 : index
    %c0_1 = arith.constant 0 : index
    %c0_2 = arith.constant 0 : index
    %0 = vector.load %arg1[%c0, %c0_0, %c0_1, %c0_2] : memref<1x18x18x128xbf16, #tpu.memory_space<vmem>>, vector<1x18x18x128xbf16>
    %1 = vector.shape_cast %0 : vector<1x18x18x128xbf16> to vector<18x18x128xbf16>
    %2 = vector.extract_strided_slice %1 {offsets = [0, 0, 0], sizes = [16, 16, 128], strides = [1, 1, 1]} : vector<18x18x128xbf16> to vector<16x16x128xbf16>
    %3 = vector.shape_cast %2 : vector<16x16x128xbf16> to vector<256x128xbf16>
    %4 = vector.extract_strided_slice %1 {offsets = [0, 1, 0], sizes = [16, 16, 128], strides = [1, 1, 1]} : vector<18x18x128xbf16> to vector<16x16x128xbf16>
    %5 = vector.shape_cast %4 : vector<16x16x128xbf16> to vector<256x128xbf16>
    %6 = vector.extract_strided_slice %1 {offsets = [0, 2, 0], sizes = [16, 16, 128], strides = [1, 1, 1]} : vector<18x18x128xbf16> to vector<16x16x128xbf16>
    %7 = vector.shape_cast %6 : vector<16x16x128xbf16> to vector<256x128xbf16>
    %8 = vector.extract_strided_slice %1 {offsets = [1, 0, 0], sizes = [16, 16, 128], strides = [1, 1, 1]} : vector<18x18x128xbf16> to vector<16x16x128xbf16>
    %9 = vector.shape_cast %8 : vector<16x16x128xbf16> to vector<256x128xbf16>
    %10 = vector.extract_strided_slice %1 {offsets = [1, 1, 0], sizes = [16, 16, 128], strides = [1, 1, 1]} : vector<18x18x128xbf16> to vector<16x16x128xbf16>
    %11 = vector.shape_cast %10 : vector<16x16x128xbf16> to vector<256x128xbf16>
    %12 = vector.extract_strided_slice %1 {offsets = [1, 2, 0], sizes = [16, 16, 128], strides = [1, 1, 1]} : vector<18x18x128xbf16> to vector<16x16x128xbf16>
    %13 = vector.shape_cast %12 : vector<16x16x128xbf16> to vector<256x128xbf16>
    %14 = vector.extract_strided_slice %1 {offsets = [2, 0, 0], sizes = [16, 16, 128], strides = [1, 1, 1]} : vector<18x18x128xbf16> to vector<16x16x128xbf16>
    %15 = vector.shape_cast %14 : vector<16x16x128xbf16> to vector<256x128xbf16>
    %16 = vector.extract_strided_slice %1 {offsets = [2, 1, 0], sizes = [16, 16, 128], strides = [1, 1, 1]} : vector<18x18x128xbf16> to vector<16x16x128xbf16>
    %17 = vector.shape_cast %16 : vector<16x16x128xbf16> to vector<256x128xbf16>
    %18 = vector.extract_strided_slice %1 {offsets = [2, 2, 0], sizes = [16, 16, 128], strides = [1, 1, 1]} : vector<18x18x128xbf16> to vector<16x16x128xbf16>
    %19 = vector.shape_cast %18 : vector<16x16x128xbf16> to vector<256x128xbf16>
    %20 = tpu.concatenate %3, %5, %7, %9, %11, %13, %15, %17, %19 in 1 : vector<256x128xbf16>, vector<256x128xbf16>, vector<256x128xbf16>, vector<256x128xbf16>, vector<256x128xbf16>, vector<256x128xbf16>, vector<256x128xbf16>, vector<256x128xbf16>, vector<256x128xbf16> -> vector<256x1152xbf16>
    %c0_3 = arith.constant 0 : index
    %c0_4 = arith.constant 0 : index
    %21 = vector.load %arg2[%c0_3, %c0_4] : memref<1152x128xbf16, #tpu.memory_space<vmem>>, vector<1152x128xbf16>
    %cst = arith.constant dense<0.000000e+00> : vector<256x128xf32>
    %22 = tpu.matmul %20, %21, %cst {dimension_numbers = #tpu.dot_dimension_numbers<[1], [0], [0], [1], [0, 0, 1, 1], [], []>} : vector<256x1152xbf16>, vector<1152x128xbf16>, vector<256x128xf32> -> vector<256x128xf32>
    %c0_5 = arith.constant 0 : index
    %c0_6 = arith.constant 0 : index
    %23 = vector.load %arg3[%c0_5, %c0_6] : memref<1x128xf32, #tpu.memory_space<vmem>>, vector<1x128xf32>
    %24 = vector.broadcast %23 : vector<1x128xf32> to vector<256x128xf32>
    %25 = arith.addf %22, %24 : vector<256x128xf32>
    %c0_7 = arith.constant 0 : index
    %c0_8 = arith.constant 0 : index
    %26 = vector.load %arg4[%c0_7, %c0_8] : memref<256x128xf32, #tpu.memory_space<vmem>>, vector<256x128xf32>
    tpu.vector_store %arg4[%c0_7, %c0_8], %25 {strides = array<i32>} : memref<256x128xf32, #tpu.memory_space<vmem>>, vector<256x128xf32>,
    %cst_9 = arith.constant dense<0.000000e+00> : vector<128xf32>
    %27 = vector.multi_reduction <add>, %25, %cst_9 [0] : vector<256x128xf32> to vector<128xf32>
    %28 = vector.shape_cast %27 : vector<128xf32> to vector<1x128xf32>
    %29 = arith.mulf %25, %25 : vector<256x128xf32>
    %cst_10 = arith.constant dense<0.000000e+00> : vector<128xf32>
    %30 = vector.multi_reduction <add>, %29, %cst_10 [0] : vector<256x128xf32> to vector<128xf32>
    %31 = vector.shape_cast %30 : vector<128xf32> to vector<1x128xf32>
    %cst_11 = arith.constant 0.000000e+00 : f32
    %32 = vector.broadcast %cst_11 : f32 to vector<6x128xf32>
    %33 = tpu.concatenate %28, %31, %32 in 0 : vector<1x128xf32>, vector<1x128xf32>, vector<6x128xf32> -> vector<8x128xf32>
    %c0_12 = arith.constant 0 : index
    %c0_13 = arith.constant 0 : index
    %c0_14 = arith.constant 0 : index
    %34 = vector.load %arg5[%c0_12, %c0_13, %c0_14] : memref<1x8x128xf32, #tpu.memory_space<vmem>>, vector<1x8x128xf32>
    %35 = vector.shape_cast %34 : vector<1x8x128xf32> to vector<8x128xf32>
    %36 = vector.shape_cast %33 : vector<8x128xf32> to vector<1x8x128xf32>
    tpu.vector_store %arg5[%c0_12, %c0_13, %c0_14], %36 {strides = array<i32>} : memref<1x8x128xf32, #tpu.memory_space<vmem>>, vector<1x8x128xf32>,
    return
  }
  func.func @transform_0(%arg0: i32) -> (i32, i32, i32, i32) {
    %c0_i32 = arith.constant 0 : i32
    %c0_i32_0 = arith.constant 0 : i32
    %c0_i32_1 = arith.constant 0 : i32
    %c0_i32_2 = arith.constant 0 : i32
    return %arg0, %c0_i32, %c0_i32_0, %c0_i32_1 : i32, i32, i32, i32
  }
  func.func @transform_1(%arg0: i32) -> (i32, i32) {
    %c0_i32 = arith.constant 0 : i32
    %c0_i32_0 = arith.constant 0 : i32
    %c0_i32_1 = arith.constant 0 : i32
    return %c0_i32, %c0_i32_0 : i32, i32
  }
  func.func @transform_2(%arg0: i32) -> (i32, i32) {
    %c0_i32 = arith.constant 0 : i32
    %c0_i32_0 = arith.constant 0 : i32
    %c0_i32_1 = arith.constant 0 : i32
    return %c0_i32, %c0_i32_0 : i32, i32
  }
  func.func @transform_3(%arg0: i32) -> (i32, i32) {
    %c0_i32 = arith.constant 0 : i32
    %c0_i32_0 = arith.constant 0 : i32
    return %arg0, %c0_i32 : i32, i32
  }
  func.func @transform_4(%arg0: i32) -> (i32, i32, i32) {
    %c0_i32 = arith.constant 0 : i32
    %c0_i32_0 = arith.constant 0 : i32
    %c0_i32_1 = arith.constant 0 : i32
    return %arg0, %c0_i32, %c0_i32_0 : i32, i32, i32
  }
}

</mosaic_0001>

<bundles_post_ra>
// kernel: tpu_custom_call.1
= control target key start
LH: loop header
LB: loop body
LE: loop exit
PB: predicated region body
PF: predicated region fallthrough
CT: control target
= control target key end

     0   :  { %10 = vsyncpa [#allocation3], 0  ;;  %s5195_s0 = inlined_call_operand.vmem [shape: bf16[2,18,18,128], index: 0, kind: input, shape index: {}]   ;;  %s5196_s1 = inlined_call_operand.vmem [shape: bf16[1152,128], index: 1, kind: input, shape index: {}]   ;;  %s5197_s2 = inlined_call_operand.vmem [shape: f32[1,128], index: 2, kind: input, shape index: {}]   ;;  %s5198_s3 = inlined_call_operand.hbm [shape: f32[512,128], index: 3, kind: output, shape index: {0}]   ;;  %s5199_s4 = inlined_call_operand.hbm [shape: f32[2,8,128], index: 4, kind: output, shape index: {1}]  }
   0x1   :  { %12 = vsyncpa [#allocation3 + $0x1], 0 }
   0x2   :  { %13 = vsyncpa [#allocation5], 0 }
   0x3   :  { %15 = vsyncpa [#allocation5 + $0x1], 0  ;;  %s3724_s15 = smov 0   ;;  %s3726_s16 = smov 0  }
   0x4   :  { %s3728_s17 = smov 0   ;;  %s3730_s18 = smov 0  }
   0x5 LB: > { %s3745_s19 = sadd.s32 4294967295, %s3693_s18   ;;  %s2754_s20 = sadd.s32 4294967294, %s3693_s18   ;;  %s3693_s18 = sphi %s3730_s18, %s5234_s18   ;;  %s3689_s17 = sphi %s3728_s17, %s5233_s17   ;;  %s3685_s16 = sphi %s3726_s16, %s5232_s16   ;;  %s3681_s15 = sphi %s3724_s15, %s5231_s15  }
   0x6   : > { %s3749_s21 = sadd.s32 1, %s3693_s18   ;;  %s96_s22 = sadd.s32 1, %s3689_s17 }
   0x7   : > { %s93_s23 = ssub.s32 %s3693_s18, %s3749_s21  ;;  %p106_p0 = scmp.ne.s32.totalorder %s3689_s17, %s3685_s16 }
   0x8   : > { %p94_p1 = scmp.eq.s32.totalorder %s93_s23, 0  ;;  %p107_p2 = scmp.eq.s32.totalorder %s3745_s19, 1 }
   0x9   : > { %p112_p3 = scmp.ne.s32.totalorder %s3685_s16, %s3681_s15  ;;  %p113_p4 = scmp.eq.s32.totalorder %s2754_s20, 1 }
   0xa   : > { %s3760_s24 = scalar_select %p94_p1, %s3689_s17, %s96_s22  }
   0xb   : > { %p3762_p5 = por %p107_p2, %p106_p0  ;;  %p3766_p6 = por %p113_p4, %p112_p3 }
   0xc   : > { %p2757_p7 = scmp.ge.s32.totalorder %s3693_s18, 1  ;;  %p171_p8 = scmp.lt.s32.totalorder %s3693_s18, 3 }
   0xe   : > { %p172_p9 = pnand %p2757_p7, %p171_p8 }
  0x10   : > { %175 = sbr.rel (%p172_p9) target bundleno = 606 (0x25e), region = 32 }
  0x17   : > { %v3497_v0 = vld [vmem:[%s5196_s1 + $0x40] sm:$0xff]   ;;  %p202_p10 = scmp.lt.s32.totalorder %s3745_s19, 1  ;;  %v3499_v2 = vld [vmem:[%s5196_s1 + $0x48] sm:$0xff]   ;;  %v3501_v4 = vld [vmem:[%s5196_s1 + $0x50] sm:$0xff]   ;;  %vm263_vm0 = vsmask.f32 3328 }
  0x18   : > { %v3498_v1 = vld [vmem:[%s5196_s1] sm:$0xff]   ;;  %2914 = vmatprep.subr.bf16.mxu0 %v3497_v0  ;;  %3434 = vmatprep.subr.bf16.mxu1 %v3497_v0  ;;  %v3500_v3 = vld [vmem:[%s5196_s1 + $0x8] sm:$0xff]   ;;  %v3502_v5 = vld [vmem:[%s5196_s1 + $0x10] sm:$0xff]   ;;  %vm264_vm1 = vsmask.f32 7440  ;;  %vm698_vm3 = vcmask 1042432  }
  0x19   : > { %2915 = vmatpush3.bf16.msra.mxu0 %v3498_v1  ;;  %3442 = vmatpush3.bf16.msra.mxu1 %v3498_v1  ;;  %s203_s11 = scalar_select %p202_p10, %s3745_s19, 1  ;;  %v3503_v6 = vld [vmem:[%s5196_s1 + $0x58] sm:$0xff]   ;;  %v3505_v8 = vld [vmem:[%s5196_s1 + $0x60] sm:$0xff]   ;;  %v3507_v10 = vld [vmem:[%s5196_s1 + $0x68] sm:$0xff]   ;;  %vm699_vm4 = vcmask 1046532  }
  0x1a   : > { %2916 = vmatprep.subr.bf16.mxu0 %v3499_v2  ;;  %3435 = vmatprep.subr.bf16.mxu1 %v3499_v2  ;;  %v3504_v7 = vld [vmem:[%s5196_s1 + $0x18] sm:$0xff]   ;;  %v3506_v9 = vld [vmem:[%s5196_s1 + $0x20] sm:$0xff]   ;;  %v3508_v16 = vld [vmem:[%s5196_s1 + $0x28] sm:$0xff]   ;;  %s2913_s9 = sshll.u32 %s3745_s19, 12 }
  0x1b   : > { %s3450_s22 = smul.u32 216, %s203_s11  ;;  %v3509_v21 = vld [vmem:[%s5196_s1 + $0x70] sm:$0xff]   ;;  %v3511_v36 = vld [vmem:[%s5196_s1 + $0x78] sm:$0xff]   ;;  %vm3849_vm2 = vmor %vm263_vm0, %vm264_vm1  ;;  %s5117_s13 = scalar_lea.hbm %s5198_s3, %s2913_s9 }
  0x1c   : > { %v3510_v31 = vld [vmem:[%s5196_s1 + $0x30] sm:$0xff]   ;;  %v3512_v50 = vld [vmem:[%s5196_s1 + $0x38] sm:$0xff]   ;;  %v3515_v57 = vld [vmem:[%s5196_s1 + $0xc0] sm:$0xff]  }
  0x1d   : > { %2917 = vmatpush3.bf16.msra.mxu0 %v3500_v3  ;;  %3443 = vmatpush3.bf16.msra.mxu1 %v3500_v3  ;;  %s3804_s6 = scalar_lea.vmem %s5195_s0, %s3450_s22  ;;  %v3516_v60 = vld [vmem:[%s5196_s1 + $0x140] sm:$0xff]   ;;  %vm4042_vm5 = vmor %vm698_vm3, %vm699_vm4  ;;  %s3695_s22 = smov [#allocation2]  }
  0x1e   : > { %2918 = vmatprep.subr.bf16.mxu0 %v3501_v4  ;;  %3436 = vmatprep.subr.bf16.mxu1 %v3501_v4  ;;  %v3813_v11 = vld [vmem:[%s3804_s6] sm:$0xf]  ;;  %v3816_v12 = vld [vmem:[%s3804_s6 + $0x4] sm:$0xf]  ;;  %v3819_v13 = vld [vmem:[%s3804_s6 + $0x8] sm:$0x1] }
  0x1f   : > { %v267_v14 = vshrl.u32 %v3813_v11, 16  ;;  %v270_v15 = vshll.u32 %v3813_v11, 16  ;;  %v276_v17 = vshll.u32 %v3816_v12, 16  ;;  %v280_v18 = vshrl.u32 %v3816_v12, 16  ;;  %v3830_v20 = vld [vmem:[%s3804_s6 + $0x90] sm:$0xf] }
  0x20   : > { %v286_v19 = vshll.u32 %v3819_v13, 16  ;;  %v2761_v24 = vrot.slane %v3813_v11, 9  ;;  %v246_v25 = vld [vmem:[%s3804_s6 + $0x94] sm:$0xf]  ;;  %v703_v28 = vrot.slane %v3816_v12, 5  ;;  %v555_v30 = vshrl.u32 %v3830_v20, 16 }
  0x21   : > { %2919 = vmatpush3.bf16.msra.mxu0 %v3502_v5  ;;  %3444 = vmatpush3.bf16.msra.mxu1 %v3502_v5  ;;  %v269_v22 = vrot.slane %v267_v14, 4  ;;  %v272_v23 = vrot.slane %v270_v15, 5  ;;  %v278_v26 = vrot.slane %v276_v17, 5  ;;  %v282_v27 = vrot.slane %v280_v18, 4  ;;  %v247_v29 = vld [vmem:[%s3804_s6 + $0x98] sm:$0x1] }
  0x22   : > { %2920 = vmatprep.subr.bf16.mxu0 %v3503_v6  ;;  %3437 = vmatprep.subr.bf16.mxu1 %v3503_v6  ;;  %v288_v33 = vrot.slane %v286_v19, 5  ;;  %v558_v34 = vshll.u32 %v3830_v20, 16  ;;  %v564_v35 = vshll.u32 %v246_v25, 16  ;;  %v557_v39 = vrot.slane %v555_v30, 4  ;;  %v3874_v61 = vld [vmem:[%s3804_s6 + $0xc] sm:$0xf] }
  0x23   : > { %v273_v32 = vor.u32 %v272_v23, %v269_v22  ;;  %v283_v38 = vor.u32 %v282_v27, %v278_v26  ;;  %v568_v40 = vshrl.u32 %v246_v25, 16  ;;  %v574_v41 = vshll.u32 %v247_v29, 16  ;;  %v3877_v62 = vld [vmem:[%s3804_s6 + $0x10] sm:$0xf]  ;;  %v3517_v0 = vld [vmem:[%s5196_s1 + $0x80] sm:$0xff]   ;;  %s3603_s23 = sshll.u32 %s3695_s22, 4  ;;  %s3604_s23 = int_to_ptr.vmem [resolvable:$false] %s3603_s23 }
  0x24   : > { %v706_v43 = vrot.slane %v3819_v13, 5  ;;  %v560_v44 = vrot.slane %v558_v34, 5  ;;  %v566_v45 = vrot.slane %v564_v35, 5  ;;  %v3856_v47 = vrot.slane %v703_v28, 4  ;;  %v3518_v1 = vld [vmem:[%s5196_s1 + $0x100] sm:$0xff]   ;;  %v3523_v35 = vld [vmem:[%s5196_s1 + $0xd0] sm:$0xff]  }
  0x25   : > { %2921 = vmatpush3.bf16.msra.mxu0 %v3504_v7  ;;  %3445 = vmatpush3.bf16.msra.mxu1 %v3504_v7  ;;  %v274_v42 = vrot.slane %v273_v32, 4  ;;  %v284_v46 = vrot.slane %v283_v38, 4  ;;  %v570_v48 = vrot.slane %v568_v40, 4  ;;  %v576_v49 = vrot.slane %v574_v41, 5  ;;  %v3888_v2 = vld [vmem:[%s3804_s6 + $0x14] sm:$0x1] }
  0x26   : > { %2922 = vmatprep.subr.bf16.mxu0 %v3505_v8  ;;  %3438 = vmatprep.subr.bf16.mxu1 %v3505_v8  ;;  %v561_v52 = vor.u32 %v560_v44, %v557_v39  ;;  %v2779_v59 = vcombine.low %v3813_v11, %v3816_v12  ;;  %v291_v3 = vshrl.u32 %v3874_v61, 16  ;;  %v294_v4 = vshll.u32 %v3874_v61, 16  ;;  %v249_v14 = vld [vmem:[%s3804_s6 + $0xa0] sm:$0xf]  ;;  %v3526_v44 = vld [vmem:[%s5196_s1 + $0x148] sm:$0xff]   ;;  %v3547_v13 = vld [vmem:[%s5196_s1 + $0x118] sm:$0xff]  }
  0x27   : > { %v279_v51 = vsel %vm3849_vm2, %v274_v42, %v278_v26  ;;  %v289_v53 = vsel %vm3849_vm2, %v284_v46, %v288_v33  ;;  %v571_v54 = vor.u32 %v570_v48, %v566_v45  ;;  %v300_v5 = vshll.u32 %v3877_v62, 16  ;;  %v3520_v26 = vld [vmem:[%s5196_s1 + $0x88] sm:$0xff]   ;;  %s3605_s27 = scalar_lea.vmem %s3604_s23, 8192 }
  0x28   : > { %v2795_v55 = vcombine.low %v279_v51, %v289_v53  ;;  %v562_v56 = vrot.slane %v561_v52, 4  ;;  %v3896_v7 = vcombine.low %v3830_v20, %v246_v25  ;;  %v304_v8 = vshrl.u32 %v3877_v62, 16  ;;  %v3524_v51 = vld [vmem:[%s5196_s1 + $0x90] sm:$0xff]  }
  0x29   : > { %2923 = vmatpush3.bf16.msra.mxu0 %v3506_v9  ;;  %3446 = vmatpush3.bf16.msra.mxu1 %v3506_v9  ;;  %v572_v58 = vrot.slane %v571_v54, 4  ;;  %v310_v9 = vshll.u32 %v3888_v2, 16  ;;  %v293_v17 = vrot.slane %v291_v3, 4  ;;  %v296_v18 = vrot.slane %v294_v4, 5  ;;  %v3528_v54 = vld [vmem:[%s5196_s1 + $0x108] sm:$0xff]  }
  0x2a   : > { %2924 = vmatprep.subr.bf16.mxu0 %v3507_v10  ;;  %3439 = vmatprep.subr.bf16.mxu1 %v3507_v10  ;;  %v567_v63 = vsel %vm3849_vm2, %v562_v56, %v566_v45  ;;  %v248_v10 = vld [vmem:[%s3804_s6 + $0x9c] sm:$0xf]  ;;  %v302_v19 = vrot.slane %v300_v5, 5  ;;  %v306_v20 = vrot.slane %v304_v8, 4  ;;  %v588_v29 = vshll.u32 %v249_v14, 16 }
  0x2b   : > { %1712 = vmatprep.mubr.bf16.mxu0 %v2795_v55  ;;  %v577_v6 = vsel %vm3849_vm2, %v572_v58, %v576_v49  ;;  %v312_v22 = vrot.slane %v310_v9, 5  ;;  %v579_v23 = vshrl.u32 %v248_v10, 16  ;;  %v582_v25 = vshll.u32 %v248_v10, 16  ;;  %v3936_v55 = vld [vmem:[%s3804_s6 + $0x18] sm:$0xf] }
  0x2c   : > { %v3902_v15 = vcombine.low %v567_v63, %v577_v6  ;;  %v297_v27 = vor.u32 %v296_v18, %v293_v17  ;;  %v592_v30 = vshrl.u32 %v249_v14, 16  ;;  %v307_v32 = vor.u32 %v306_v20, %v302_v19  ;;  %v3939_v56 = vld [vmem:[%s3804_s6 + $0x1c] sm:$0xf]  ;;  %v251_v6 = vld [vmem:[%s3804_s6 + $0xa8] sm:$0xf] }
  0x2d   : > { %2925 = vmatpush3.bf16.msra.mxu0 %v3508_v16  ;;  %3447 = vmatpush3.bf16.msra.mxu1 %v3508_v16  ;;  %v3519_v16 = vld [vmem:[%s5196_s1 + $0xc8] sm:$0xff]   ;;  %v581_v33 = vrot.slane %v579_v23, 4  ;;  %v584_v34 = vrot.slane %v582_v25, 5  ;;  %v590_v38 = vrot.slane %v588_v29, 5  ;;  %v3525_v58 = vld [vmem:[%s5196_s1 + $0xd8] sm:$0xff]   ;;  %v318_v63 = vshll.u32 %v3936_v55, 16 }
  0x2e   : > { %2926 = vmatprep.subr.bf16.mxu0 %v3509_v21  ;;  %3440 = vmatprep.subr.bf16.mxu1 %v3509_v21  ;;  %5215 = vst [vmem:[#allocation8_spill] sm:$0xff] %v3902_v15  ;;  %v250_v21 = vld [vmem:[%s3804_s6 + $0xa4] sm:$0x1]  ;;  %v594_v39 = vrot.slane %v592_v30, 4  ;;  %v308_v41 = vrot.slane %v307_v32, 4  ;;  %v3955_v3 = vcombine.low %v248_v10, %v249_v14  ;;  %v328_v4 = vshrl.u32 %v3939_v56, 16 }
  0x2f   : > { %1808 = vmatprep.mubr.bf16.mxu1 %v3902_v15  ;;  %v585_v42 = vor.u32 %v584_v34, %v581_v33  ;;  %v252_v8 = vld [vmem:[%s3804_s6 + $0xac] sm:$0xf]  ;;  %v320_v18 = vrot.slane %v318_v63, 5  ;;  %v253_v10 = vld [vmem:[%s3804_s6 + $0xb0] sm:$0x1]  ;;  %v603_v20 = vshrl.u32 %v251_v6, 16 }
  0x30   : > { %v595_v46 = vor.u32 %v594_v39, %v590_v38  ;;  %v313_v48 = vsel %vm3849_vm2, %v308_v41, %v312_v22  ;;  %v330_v14 = vrot.slane %v328_v4, 4  ;;  %v606_v22 = vshll.u32 %v251_v6, 16  ;;  %v3531_v29 = vld [vmem:[%s5196_s1 + $0xe0] sm:$0xff]   ;;  %v4383_v15 = vld [vmem:[%s3804_s6 + $0x8c] sm:$0x1] }
  0x31   : > { %2927 = vmatpush3.bf16.msra.mxu0 %v3510_v31  ;;  %3448 = vmatpush3.bf16.msra.mxu1 %v3510_v31  ;;  %v598_v31 = vshll.u32 %v250_v21, 16  ;;  %v586_v49 = vrot.slane %v585_v42, 4  ;;  %v612_v25 = vshll.u32 %v252_v8, 16  ;;  %v3532_v33 = vld [vmem:[%s5196_s1 + $0xa0] sm:$0xff]  }
  0x32   : > { %2928 = vmatprep.subr.bf16.mxu0 %v3511_v36  ;;  %3441 = vmatprep.subr.bf16.mxu1 %v3511_v36  ;;  %v298_v36 = vrot.slane %v297_v27, 4  ;;  %v596_v53 = vrot.slane %v595_v46, 4  ;;  %v622_v27 = vshll.u32 %v253_v10, 16  ;;  %v608_v32 = vrot.slane %v606_v22, 5  ;;  %v3537_v10 = vld [vmem:[%s5196_s1 + $0xf0] sm:$0xff]  }
  0x33   : > { %v600_v40 = vrot.slane %v598_v31, 5  ;;  %v605_v31 = vrot.slane %v603_v20, 4  ;;  %v3985_v46 = vcombine.low %v251_v6, %v252_v8  ;;  %v3538_v6 = vld [vmem:[%s5196_s1 + $0x150] sm:$0xff]   ;;  %v256_v22 = vld [vmem:[%s3804_s6 + $0xbc] sm:$0x1] }
  0x34   : > { %v303_v45 = vsel %vm3849_vm2, %v298_v36, %v302_v19  ;;  %v624_v41 = vrot.slane %v622_v27, 5 }
  0x35   : > { %2929 = vmatpush3.bf16.msra.mxu0 %v3512_v50  ;;  %3449 = vmatpush3.bf16.msra.mxu1 %v3512_v50  ;;  %v3925_v50 = vcombine.low %v3874_v61, %v3877_v62  ;;  %v3930_v52 = vcombine.low %v303_v45, %v313_v48  ;;  %v3983_v45 = vcombine.low %v3936_v55, %v3939_v56  ;;  %v3988_v48 = vld [vmem:[%s3804_s6 + $0x24] sm:$0xf] }
  0x36   : > { %3026 = vmatprep.subr.bf16.mxu1 %v3515_v57  ;;  %3138 = vmatprep.subr.bf16.mxu0 %v3516_v60  ;;  %v591_v57 = vsel %vm3849_vm2, %v586_v49, %v590_v38  ;;  %v315_v60 = vshrl.u32 %v3936_v55, 16  ;;  %v3533_v38 = vld [vmem:[%s5196_s1 + $0xe8] sm:$0xff]  }
  0x37   : > { %v3991_v49 = vld [vmem:[%s3804_s6 + $0x28] sm:$0xf] }
  0x38   : > { %1713 = vmatmul.mubr.bf16.vlgmr.msra.gmra.mrb[0].mxu0 %v2779_v59  ;;  %1809 = vmatmul.mubr.bf16.vlgmr.msra.gmra.mrb[0].mxu1 %v3896_v7  ;;  %v3947_v59 = vld [vmem:[%s3804_s6 + $0x20] sm:$0x1]  ;;  %v317_v17 = vrot.slane %v315_v60, 4  ;;  %v342_v60 = vshll.u32 %v3988_v48, 16  ;;  %v352_v4 = vshrl.u32 %v3991_v49, 16 }
  0x39   : > { %3027 = vmatpush3.bf16.msra.mxu1 %v3517_v0  ;;  %3139 = vmatpush3.bf16.msra.mxu0 %v3518_v1  ;;  %v324_v0 = vshll.u32 %v3939_v56, 16  ;;  %v601_v1 = vsel %vm3849_vm2, %v596_v53, %v600_v40  ;;  %v334_v5 = vshll.u32 %v3947_v59, 16  ;;  %v609_v40 = vor.u32 %v608_v32, %v605_v31 }
  0x3a   : > { %3028 = vmatprep.subr.bf16.mxu1 %v3519_v16  ;;  %3140 = vmatprep.subr.bf16.mxu0 %v3526_v44  ;;  %v3961_v9 = vcombine.low %v591_v57, %v601_v1  ;;  %v3527_v16 = vld [vmem:[%s5196_s1 + $0x98] sm:$0xff]   ;;  %v321_v23 = vor.u32 %v320_v18, %v317_v17  ;;  %v3999_v57 = vld [vmem:[%s3804_s6 + $0x2c] sm:$0x1]  ;;  %v348_v1 = vshll.u32 %v3991_v49, 16  ;;  %v344_v17 = vrot.slane %v342_v60, 5 }
  0x3b   : > { %1720 = vmatprep.mubr.bf16.mxu0 %v3930_v52  ;;  %v326_v19 = vrot.slane %v324_v0, 5  ;;  %v336_v21 = vrot.slane %v334_v5, 5  ;;  %v610_v53 = vrot.slane %v609_v40, 4  ;;  %v4008_v5 = vld [vmem:[%s3804_s6 + $0xb4] sm:$0xf]  ;;  %v358_v18 = vshll.u32 %v3999_v57, 16 }
  0x3c   : > { %5216 = vst [vmem:[#allocation9_spill] sm:$0xff] %v3961_v9  ;;  %1816 = vmatprep.mubr.bf16.mxu1 %v3961_v9  ;;  %v322_v34 = vrot.slane %v321_v23, 4  ;;  %v354_v20 = vrot.slane %v352_v4, 4  ;;  %v627_v23 = vshrl.u32 %v4008_v5, 16  ;;  %v3542_v60 = vld [vmem:[%s5196_s1 + $0xb8] sm:$0xff]   ;;  %v4059_v4 = vcombine.low %v3988_v48, %v3991_v49 }
  0x3d   : > { %3029 = vmatpush3.bf16.msra.mxu1 %v3520_v26  ;;  %3141 = vmatpush3.bf16.msra.mxu0 %v3528_v54  ;;  %v616_v26 = vshrl.u32 %v252_v8, 16  ;;  %v331_v30 = vor.u32 %v330_v14, %v326_v19  ;;  %v3534_v54 = vld [vmem:[%s5196_s1 + $0xa8] sm:$0xff]  }
  0x3e   : > { %3030 = vmatprep.subr.bf16.mxu1 %v3523_v35  ;;  %v614_v35 = vrot.slane %v612_v25, 5  ;;  %v327_v42 = vsel %vm3849_vm2, %v322_v34, %v326_v19  ;;  %v4017_v19 = vld [vmem:[%s3804_s6 + $0xb8] sm:$0xf]  ;;  %v3540_v25 = vld [vmem:[%s5196_s1 + $0x110] sm:$0xff]   ;;  %3142 = vmatprep.subr.bf16.mxu0 %v3538_v6  ;;  %v629_v32 = vrot.slane %v627_v23, 4  ;;  %5220 = vst [vmem:[#allocation11_spill] sm:$0xff] %v4059_v4 }
  0x3f   : > { %v618_v36 = vrot.slane %v616_v26, 4  ;;  %v332_v39 = vrot.slane %v331_v30, 4  ;;  %v630_v30 = vshll.u32 %v4008_v5, 16  ;;  %v640_v34 = vshrl.u32 %v4017_v19, 16  ;;  %v3544_v6 = vld [vmem:[%s5196_s1 + $0x1c0] sm:$0xff]  }
  0x40   : > { %1721 = vmatmul.mubr.bf16.gmra.mrb[4].mxu0 %v3925_v50  ;;  %1817 = vmatmul.mubr.bf16.gmra.mrb[4].mxu1 %v3955_v3  ;;  %v615_v8 = vsel %vm3849_vm2, %v610_v53, %v614_v35  ;;  %v4110_v23 = vcombine.low %v4008_v5, %v4017_v19 }
  0x41   : > { %3031 = vmatpush3.bf16.msra.mxu1 %v3524_v51  ;;  %v619_v44 = vor.u32 %v618_v36, %v614_v35  ;;  %v337_v51 = vsel %vm3849_vm2, %v332_v39, %v336_v21  ;;  %v350_v21 = vrot.slane %v348_v1, 5  ;;  %3143 = vmatpush3.bf16.msra.mxu0 %v3540_v25  ;;  %v632_v36 = vrot.slane %v630_v30, 5  ;;  %v3539_v39 = vld [vmem:[%s5196_s1 + $0xb0] sm:$0xff]  }
  0x42   : > { %3032 = vmatprep.subr.bf16.mxu1 %v3525_v58  ;;  %v339_v58 = vshrl.u32 %v3988_v48, 16  ;;  %v4003_v63 = vcombine.low %v327_v42, %v337_v51  ;;  %v3541_v51 = vld [vmem:[%s5196_s1 + $0xf8] sm:$0xff]  }
  0x43   : > { %v620_v0 = vrot.slane %v619_v44, 4  ;;  %v355_v31 = vor.u32 %v354_v20, %v350_v21  ;;  %v642_v44 = vrot.slane %v640_v34, 4  ;;  %v4088_v20 = vsel %vm4042_vm5, %v2761_v24, %v703_v28  ;;  %v3550_v24 = vld [vmem:[%s5196_s1 + $0x160] sm:$0xff]  }
  0x44   : > { %1728 = vmatprep.mubr.bf16.mxu0 %v4003_v63 }
  0x45   : > { %3033 = vmatpush3.bf16.msra.mxu1 %v3527_v16  ;;  %v341_v16 = vrot.slane %v339_v58, 4  ;;  %v625_v14 = vsel %vm3849_vm2, %v620_v0, %v624_v41  ;;  %v356_v41 = vrot.slane %v355_v31, 4 }
  0x46   : > { %3034 = vmatprep.subr.bf16.mxu1 %v3531_v29  ;;  %v4030_v26 = vcombine.low %v615_v8, %v625_v14  ;;  %v360_v29 = vrot.slane %v358_v18, 5  ;;  %v4074_v18 = vsel %vm4042_vm5, %v3856_v47, %v706_v43  ;;  %v4077_v14 = vld [vmem:[%s3804_s6 + $0x30] sm:$0xf]  ;;  %v4097_v47 = vld [vmem:[%s3804_s6 + $0x38] sm:$0x1] }
  0x47   : > { %v345_v27 = vor.u32 %v344_v17, %v341_v16  ;;  %v3546_v17 = vld [vmem:[%s5196_s1 + $0x158] sm:$0xff]   ;;  %v366_v12 = vshll.u32 %v4077_v14, 16 }
  0x48   : > { %5217 = vst [vmem:[#allocation10_spill] sm:$0xff] %v4030_v26  ;;  %1729 = vmatmul.mubr.bf16.gmra.mrb[8].mxu0 %v3983_v45  ;;  %1824 = vmatprep.mubr.bf16.mxu1 %v4030_v26  ;;  %v361_v0 = vsel %vm3849_vm2, %v356_v41, %v360_v29 }
  0x49   : > { %3035 = vmatpush3.bf16.msra.mxu1 %v3532_v33  ;;  %v636_v33 = vshll.u32 %v4017_v19, 16  ;;  %v346_v35 = vrot.slane %v345_v27, 4  ;;  %3144 = vmatprep.subr.bf16.mxu0 %v3546_v17  ;;  %v382_v27 = vshll.u32 %v4097_v47, 16  ;;  %v368_v31 = vrot.slane %v366_v12, 5  ;;  %v4157_v12 = vld [vmem:[%s3804_s6 + $0x50] sm:$0x1] }
  0x4a   : > { %3036 = vmatprep.subr.bf16.mxu1 %v3533_v38  ;;  %v646_v38 = vshll.u32 %v256_v22, 16  ;;  %1825 = vmatmul.mubr.bf16.gmra.mrb[8].mxu1 %v3985_v46  ;;  %v363_v22 = vshrl.u32 %v4077_v14, 16 }
  0x4b   : > { %v638_v42 = vrot.slane %v636_v33, 5  ;;  %v351_v53 = vsel %vm3849_vm2, %v346_v35, %v350_v21  ;;  %v4080_v21 = vld [vmem:[%s3804_s6 + $0x34] sm:$0xf]  ;;  %3145 = vmatpush3.bf16.msra.mxu0 %v3547_v13  ;;  %v384_v34 = vrot.slane %v382_v27, 5  ;;  %v2811_v35 = vcombine.low %v4088_v20, %v4074_v18 }
  0x4c   : > { %v648_v58 = vrot.slane %v646_v38, 5  ;;  %v4064_v8 = vcombine.low %v351_v53, %v361_v0  ;;  %v372_v11 = vshll.u32 %v4080_v21, 16  ;;  %v376_v25 = vshrl.u32 %v4080_v21, 16  ;;  %3146 = vmatprep.subr.bf16.mxu0 %v3550_v24  ;;  %v4124_v38 = vld [vmem:[%s3804_s6 + $0x40] sm:$0xf] }
  0x4d   : > { %3037 = vmatpush3.bf16.msra.mxu1 %v3534_v54  ;;  %v633_v54 = vor.u32 %v632_v36, %v629_v32  ;;  %v643_v1 = vor.u32 %v642_v44, %v638_v42  ;;  %v365_v30 = vrot.slane %v363_v22, 4  ;;  %v4121_v36 = vld [vmem:[%s3804_s6 + $0x3c] sm:$0xf]  ;;  %v4140_v0 = vld [vmem:[%s3804_s6 + $0x48] sm:$0xf]  ;;  %v2762_v22 = vrot.slane %v3874_v61, 9 }
  0x4e   : > { %3038 = vmatprep.subr.bf16.mxu1 %v3537_v10  ;;  %1736 = vmatprep.mubr.bf16.mxu0 %v4064_v8  ;;  %v374_v32 = vrot.slane %v372_v11, 5  ;;  %v378_v33 = vrot.slane %v376_v25, 4  ;;  %v390_v44 = vshll.u32 %v4121_v36, 16  ;;  %v3555_v11 = vld [vmem:[%s5196_s1 + $0x168] sm:$0xff]   ;;  %v710_v25 = vrot.slane %v3877_v62, 5 }
  0x4f   : > { %v634_v16 = vrot.slane %v633_v54, 4  ;;  %v644_v10 = vrot.slane %v643_v1, 4  ;;  %v369_v5 = vor.u32 %v368_v31, %v365_v30  ;;  %v4135_v54 = vcombine.low %v4077_v14, %v4080_v21 }
  0x50   : > { %1737 = vmatmul.mubr.bf16.gmra.mrb[12].mxu0 %v4059_v4  ;;  %v379_v19 = vor.u32 %v378_v33, %v374_v32  ;;  %v392_v17 = vrot.slane %v390_v44, 5  ;;  %v713_v27 = vrot.slane %v3888_v2, 5  ;;  %v411_v31 = vshrl.u32 %v4140_v0, 16  ;;  %v3551_v33 = vld [vmem:[%s5196_s1 + $0x1c8] sm:$0xff]  }
  0x51   : > { %3039 = vmatpush3.bf16.msra.mxu1 %v3539_v39  ;;  %v639_v43 = vsel %vm3849_vm2, %v634_v16, %v638_v42  ;;  %v649_v28 = vsel %vm3849_vm2, %v644_v10, %v648_v58  ;;  %v4127_v39 = vld [vmem:[%s3804_s6 + $0x44] sm:$0x1]  ;;  %v370_v41 = vrot.slane %v369_v5, 4  ;;  %v387_v42 = vshrl.u32 %v4121_v36, 16  ;;  %5222 = vst [vmem:[#allocation13_spill] sm:$0xff] %v4135_v54 }
  0x52   : > { %3040 = vmatprep.subr.bf16.mxu1 %v3541_v51  ;;  %v4114_v29 = vcombine.low %v639_v43, %v649_v28  ;;  %v396_v51 = vshll.u32 %v4124_v38, 16  ;;  %v380_v53 = vrot.slane %v379_v19, 4  ;;  %v400_v58 = vshrl.u32 %v4124_v38, 16  ;;  %v4151_v10 = vld [vmem:[%s3804_s6 + $0x4c] sm:$0xf] }
  0x53   : > { %v375_v1 = vsel %vm3849_vm2, %v370_v41, %v374_v32  ;;  %v389_v16 = vrot.slane %v387_v42, 4  ;;  %v414_v32 = vshll.u32 %v4140_v0, 16  ;;  %v420_v61 = vshll.u32 %v4151_v10, 16  ;;  %v3553_v19 = vld [vmem:[%s5196_s1 + $0x188] sm:$0xff]  }
  0x54   : > { %5221 = vst [vmem:[#allocation12_spill] sm:$0xff] %v4114_v29  ;;  %1832 = vmatprep.mubr.bf16.mxu1 %v4114_v29  ;;  %v398_v18 = vrot.slane %v396_v51, 5  ;;  %v385_v20 = vsel %vm3849_vm2, %v380_v53, %v384_v34  ;;  %v402_v13 = vrot.slane %v400_v58, 4  ;;  %v711_v62 = vsel %vm4042_vm5, %v2762_v22, %v710_v25  ;;  %v3556_v41 = vld [vmem:[%s5196_s1 + $0x128] sm:$0xff]  }
  0x55   : > { %3041 = vmatpush3.bf16.msra.mxu1 %v3542_v60  ;;  %v406_v60 = vshll.u32 %v4127_v39, 16  ;;  %v4162_v24 = vcombine.low %v375_v1, %v385_v20  ;;  %v393_v28 = vor.u32 %v392_v17, %v389_v16  ;;  %v712_v5 = vrot.slane %v710_v25, 4  ;;  %v4201_v20 = vld [vmem:[%s3804_s6 + $0x58] sm:$0xf]  ;;  %v4210_v25 = vld [vmem:[%s3804_s6 + $0x5c] sm:$0x1] }
  0x56   : > { %3250 = vmatprep.subr.bf16.mxu1 %v3544_v6  ;;  %1833 = vmatmul.mubr.bf16.gmra.mrb[12].mxu1 %v4110_v23  ;;  %v3545_v6 = vld [vmem:[%s5196_s1 + $0x180] sm:$0xff]   ;;  %v403_v30 = vor.u32 %v402_v13, %v398_v18  ;;  %v424_v2 = vshrl.u32 %v4151_v10, 16  ;;  %v413_v44 = vrot.slane %v411_v31, 4  ;;  %v416_v51 = vrot.slane %v414_v32, 5  ;;  %v3558_v13 = vld [vmem:[%s5196_s1 + $0x1d0] sm:$0xff]  }
  0x57   : > { %1873 = vmatprep.mubr.bf16.mxu1 %v3925_v50  ;;  %v3552_v50 = vld [vmem:[%s5196_s1 + $0x120] sm:$0xff]   ;;  %v408_v43 = vrot.slane %v406_v60, 5  ;;  %1744 = vmatprep.mubr.bf16.mxu0 %v4162_v24  ;;  %v394_v34 = vrot.slane %v393_v28, 4  ;;  %v422_v53 = vrot.slane %v420_v61, 5  ;;  %v714_v60 = vsel %vm4042_vm5, %v712_v5, %v713_v27 }
  0x58   : > { %3147 = vmatpush3.bf16.msra.mxu0 %v3552_v50  ;;  %v404_v42 = vrot.slane %v403_v30, 4  ;;  %v426_v50 = vrot.slane %v424_v2, 4  ;;  %v430_v1 = vshll.u32 %v4157_v12, 16  ;;  %v4193_v16 = vcombine.low %v4121_v36, %v4124_v38  ;;  %v4222_v2 = vld [vmem:[%s3804_s6 + $0x60] sm:$0xf] }
  0x59   : > { %3148 = vmatprep.subr.bf16.mxu0 %v3555_v11  ;;  %1745 = vmatmul.mubr.bf16.gmra.mrb[16].mxu0 %v4135_v54  ;;  %v399_v58 = vsel %vm3849_vm2, %v394_v34, %v398_v18  ;;  %v417_v17 = vor.u32 %v416_v51, %v413_v44  ;;  %v4198_v18 = vld [vmem:[%s3804_s6 + $0x54] sm:$0xf]  ;;  %v2763_v28 = vrot.slane %v3936_v55, 9  ;;  %v717_v30 = vrot.slane %v3939_v56, 5  ;;  %v4227_v44 = vld [vmem:[%s3804_s6 + $0x64] sm:$0xf] }
  0x5a   : > { %5223 = vst [vmem:[#allocation14_spill] sm:$0xff] %v4193_v16  ;;  %v427_v11 = vor.u32 %v426_v50, %v422_v53  ;;  %v720_v31 = vrot.slane %v3947_v59, 5  ;;  %v435_v32 = vshrl.u32 %v4198_v18, 16  ;;  %v444_v55 = vshll.u32 %v4201_v20, 16  ;;  %v3559_v51 = vld [vmem:[%s5196_s1 + $0x190] sm:$0xff]  }
  0x5b   : > { %v418_v27 = vrot.slane %v417_v17, 4  ;;  %v448_v34 = vshrl.u32 %v4201_v20, 16  ;;  %v719_v5 = vrot.slane %v717_v30, 4  ;;  %v454_v50 = vshll.u32 %v4210_v25, 16 }
  0x5c   : > { %3149 = vmatpush3.bf16.msra.mxu0 %v3556_v41  ;;  %v428_v61 = vrot.slane %v427_v11, 4  ;;  %v437_v56 = vrot.slane %v435_v32, 4  ;;  %v2764_v11 = vrot.slane %v3988_v48, 9  ;;  %v4258_v48 = vld [vmem:[%s3804_s6 + $0x68] sm:$0x1] }
  0x5e   : > { %1874 = vmatmul.mubr.bf16.vlgmr.msra.gmra.mrb[16].mxu1 %v2811_v35  ;;  %v409_v35 = vsel %vm3849_vm2, %v404_v42, %v408_v43  ;;  %v432_v43 = vrot.slane %v430_v1, 5  ;;  %v446_v42 = vrot.slane %v444_v55, 5  ;;  %v3561_v1 = vld [vmem:[%s5196_s1 + $0x170] sm:$0xff]   ;;  %v468_v55 = vshll.u32 %v4227_v44, 16 }
  0x5f   : > { %3251 = vmatpush3.bf16.msra.mxu1 %v3545_v6  ;;  %1881 = vmatprep.mubr.bf16.mxu1 %v3983_v45  ;;  %v4195_v6 = vcombine.low %v711_v62, %v714_v60  ;;  %v4206_v22 = vcombine.low %v399_v58, %v409_v35  ;;  %v423_v62 = vsel %vm3849_vm2, %v418_v27, %v422_v53  ;;  %v724_v27 = vrot.slane %v3991_v49, 5 }
  0x60   : > { %3252 = vmatprep.subr.bf16.mxu1 %v3551_v33  ;;  %v438_v33 = vshll.u32 %v4198_v18, 16  ;;  %v433_v59 = vsel %vm3849_vm2, %v428_v61, %v432_v43  ;;  %v4238_v58 = vcombine.low %v4140_v0, %v4151_v10  ;;  %v718_v60 = vsel %vm4042_vm5, %v2763_v28, %v717_v30  ;;  %v3562_v43 = vld [vmem:[%s5196_s1 + $0x130] sm:$0xff]   ;;  %3150 = vmatprep.subr.bf16.mxu0 %v3561_v1 }
  0x61   : > { %1752 = vmatprep.mubr.bf16.mxu0 %v4206_v22  ;;  %v4234_v53 = vcombine.low %v423_v62, %v433_v59  ;;  %v721_v35 = vsel %vm4042_vm5, %v719_v5, %v720_v31  ;;  %v456_v28 = vrot.slane %v454_v50, 5  ;;  %v727_v30 = vrot.slane %v3999_v57, 5  ;;  %3151 = vmatpush3.bf16.msra.mxu0 %v3562_v43  ;;  %v4269_v57 = vld [vmem:[%s3804_s6 + $0x70] sm:$0xf]  ;;  %v3564_v59 = vld [vmem:[%s5196_s1 + $0x1d8] sm:$0xff]  }
  0x62   : > { %v440_v41 = vrot.slane %v438_v33, 5  ;;  %1753 = vmatmul.mubr.bf16.gmra.mrb[20].mxu0 %v4193_v16  ;;  %v459_v31 = vshrl.u32 %v4222_v2, 16  ;;  %v462_v33 = vshll.u32 %v4222_v2, 16  ;;  %v726_v62 = vrot.slane %v724_v27, 4 }
  0x63   : > { %3253 = vmatpush3.bf16.msra.mxu1 %v3553_v19  ;;  %v450_v19 = vrot.slane %v448_v34, 4  ;;  %1760 = vmatprep.mubr.bf16.mxu0 %v4234_v53  ;;  %v4262_v34 = vcombine.low %v718_v60, %v721_v35  ;;  %v472_v49 = vshrl.u32 %v4227_v44, 16  ;;  %v470_v60 = vrot.slane %v468_v55, 5 }
  0x64   : > { %3254 = vmatprep.subr.bf16.mxu1 %v3558_v13  ;;  %v441_v17 = vor.u32 %v440_v41, %v437_v56  ;;  %v461_v5 = vrot.slane %v459_v31, 4  ;;  %v4266_v56 = vld [vmem:[%s3804_s6 + $0x6c] sm:$0xf]  ;;  %v478_v35 = vshll.u32 %v4258_v48, 16 }
  0x65   : > { %v451_v13 = vor.u32 %v450_v19, %v446_v42  ;;  %v474_v1 = vrot.slane %v472_v49, 4  ;;  %v486_v55 = vshll.u32 %v4266_v56, 16  ;;  %v496_v49 = vshrl.u32 %v4269_v57, 16 }
  0x66   : > { %1882 = vmatmul.mubr.bf16.gmra.mrb[20].mxu1 %v4195_v6  ;;  %v442_v32 = vrot.slane %v441_v17, 4  ;;  %v725_v17 = vsel %vm4042_vm5, %v2764_v11, %v724_v27  ;;  %v734_v11 = vrot.slane %v4097_v47, 5  ;;  %v4294_v27 = vld [vmem:[%s3804_s6 + $0x74] sm:$0x1]  ;;  %v4306_v47 = vcombine.low %v4198_v18, %v4201_v20 }
  0x67   : > { %1889 = vmatprep.mubr.bf16.mxu1 %v4059_v4  ;;  %3255 = vmatpush3.bf16.msra.mxu1 %v3559_v51  ;;  %v452_v61 = vrot.slane %v451_v13, 4  ;;  %v464_v51 = vrot.slane %v462_v33, 5  ;;  %v728_v13 = vsel %vm4042_vm5, %v726_v62, %v727_v30  ;;  %v475_v31 = vor.u32 %v474_v1, %v470_v60 }
  0x68   : > { %v447_v41 = vsel %vm3849_vm2, %v442_v32, %v446_v42  ;;  %3256 = vmatprep.subr.bf16.mxu1 %v3564_v59  ;;  %v2765_v42 = vrot.slane %v4077_v14, 9  ;;  %v480_v32 = vrot.slane %v478_v35, 5  ;;  %v3566_v14 = vld [vmem:[%s5196_s1 + $0x178] sm:$0xff]   ;;  %v483_v33 = vshrl.u32 %v4266_v56, 16 }
  0x69   : > { %v457_v19 = vsel %vm3849_vm2, %v452_v61, %v456_v28  ;;  %v465_v43 = vor.u32 %v464_v51, %v461_v5  ;;  %v3565_v28 = vld [vmem:[%s5196_s1 + $0x198] sm:$0xff]   ;;  %v731_v61 = vrot.slane %v4080_v21, 5  ;;  %v492_v21 = vshll.u32 %v4269_v57, 16  ;;  %3152 = vmatprep.subr.bf16.mxu0 %v3566_v14 }
  0x6a   : > { %v4278_v50 = vcombine.low %v447_v41, %v457_v19  ;;  %1761 = vmatmul.mubr.bf16.gmra.mrb[24].mxu0 %v4238_v58  ;;  %v476_v62 = vrot.slane %v475_v31, 4  ;;  %v4310_v59 = vld [vmem:[%s3804_s6 + $0x78] sm:$0xf]  ;;  %v485_v51 = vrot.slane %v483_v33, 4  ;;  %v488_v1 = vrot.slane %v486_v55, 5  ;;  %v3569_v31 = vld [vmem:[%s5196_s1 + $0x1e0] sm:$0xff]  }
  0x6b   : > { %v466_v30 = vrot.slane %v465_v43, 4  ;;  %v733_v5 = vrot.slane %v731_v61, 4  ;;  %3257 = vmatpush3.bf16.msra.mxu1 %v3565_v28  ;;  %v3567_v41 = vld [vmem:[%s5196_s1 + $0x138] sm:$0xff]   ;;  %v494_v35 = vrot.slane %v492_v21, 5  ;;  %v4323_v29 = vcombine.low %v725_v17, %v728_v13  ;;  %v4333_v21 = vld [vmem:[%s5196_s1 + $0x200] sm:$0xff]  }
  0x6c   : > { %1768 = vmatprep.mubr.bf16.mxu0 %v4278_v50  ;;  %v4318_v43 = vld [vmem:[%s3804_s6 + $0x7c] sm:$0xf]  ;;  %v481_v28 = vsel %vm3849_vm2, %v476_v62, %v480_v32  ;;  %v498_v14 = vrot.slane %v496_v49, 4  ;;  %v502_v26 = vshll.u32 %v4294_v27, 16  ;;  %3153 = vmatpush3.bf16.msra.mxu0 %v3567_v41  ;;  %v4336_v13 = vld [vmem:[%s3804_s6 + $0x80] sm:$0x1] }
  0x6d   : > { %v471_v19 = vsel %vm3849_vm2, %v466_v30, %v470_v60  ;;  %v489_v30 = vor.u32 %v488_v1, %v485_v51  ;;  %3258 = vmatprep.subr.bf16.mxu1 %v3569_v31  ;;  %v507_v32 = vshrl.u32 %v4310_v59, 16  ;;  %v510_v62 = vshll.u32 %v4310_v59, 16  ;;  %v4347_v51 = vld [vmem:[%s3804_s6 + $0x84] sm:$0xf]  ;;  %3386 = vmatprep.subr.bf16.mxu0 %v4333_v21 }
  0x6e   : > { %1890 = vmatmul.mubr.bf16.gmra.mrb[24].mxu1 %v4262_v34  ;;  %v4328_v60 = vcombine.low %v471_v19, %v481_v28  ;;  %v499_v33 = vor.u32 %v498_v14, %v494_v35  ;;  %v504_v55 = vrot.slane %v502_v26, 5  ;;  %v732_v26 = vsel %vm4042_vm5, %v2765_v42, %v731_v61  ;;  %v3571_v1 = vld [vmem:[%s5196_s1 + $0x1a0] sm:$0xff]   ;;  %v3572_v14 = vld [vmem:[%s5196_s1 + $0x1e8] sm:$0xff]  }
  0x6f   : > { %1897 = vmatprep.mubr.bf16.mxu1 %v4135_v54  ;;  %v490_v17 = vrot.slane %v489_v30, 4  ;;  %v738_v41 = vrot.slane %v4124_v38, 5  ;;  %v516_v19 = vshll.u32 %v4318_v43, 16  ;;  %v735_v31 = vsel %vm4042_vm5, %v733_v5, %v734_v11  ;;  %v4358_v38 = vld [vmem:[%s3804_s6 + $0x88] sm:$0xf]  ;;  %3259 = vmatpush3.bf16.msra.mxu1 %v3571_v1 }
  0x70   : > { %v500_v49 = vrot.slane %v499_v33, 4  ;;  %v509_v28 = vrot.slane %v507_v32, 4  ;;  %v512_v42 = vrot.slane %v510_v62, 5  ;;  %v520_v61 = vshrl.u32 %v4318_v43, 16  ;;  %3260 = vmatprep.subr.bf16.mxu1 %v3572_v14 }
  0x71   : > { %v495_v30 = vsel %vm3849_vm2, %v490_v17, %v494_v35  ;;  %v518_v9 = vrot.slane %v516_v19, 5  ;;  %v526_v11 = vshll.u32 %v4336_v13, 16  ;;  %v4371_v5 = vcombine.low %v4222_v2, %v4227_v44 }
  0x72   : > { %1769 = vmatmul.mubr.bf16.gmra.mrb[28].mxu0 %v4306_v47  ;;  %v505_v33 = vsel %vm3849_vm2, %v500_v49, %v504_v55  ;;  %v513_v32 = vor.u32 %v512_v42, %v509_v28  ;;  %v522_v62 = vrot.slane %v520_v61, 4  ;;  %v2766_v35 = vrot.slane %v4121_v36, 9  ;;  %v3574_v49 = vld [vmem:[%s5196_s1 + $0x1a8] sm:$0xff]  }
  0x73   : > { %1776 = vmatprep.mubr.bf16.mxu0 %v4328_v60  ;;  %v740_v17 = vrot.slane %v738_v41, 4  ;;  %v741_v55 = vrot.slane %v4127_v39, 5  ;;  %v4380_v19 = vcombine.low %v495_v30, %v505_v33  ;;  %v531_v28 = vshrl.u32 %v4347_v51, 16  ;;  %3261 = vmatpush3.bf16.msra.mxu1 %v3574_v49  ;;  %v3577_v33 = vld [vmem:[%s5196_s1 + $0x1b0] sm:$0xff]   ;;  %v3578_v49 = vld [vmem:[%s5196_s1 + $0x1f8] sm:$0xff]  }
  0x74   : > { %v523_v1 = vor.u32 %v522_v62, %v518_v9  ;;  %v528_v36 = vrot.slane %v526_v11, 5  ;;  %v534_v42 = vshll.u32 %v4347_v51, 16  ;;  %v540_v39 = vshll.u32 %v4358_v38, 16 }
  0x75   : > { %v533_v14 = vrot.slane %v531_v28, 4  ;;  %v544_v30 = vshrl.u32 %v4358_v38, 16  ;;  %v745_v11 = vrot.slane %v4151_v10, 5  ;;  %v742_v28 = vsel %vm4042_vm5, %v740_v17, %v741_v55 }
  0x76   : > { %1898 = vmatmul.mubr.bf16.gmra.mrb[28].mxu1 %v4323_v29  ;;  %v524_v61 = vrot.slane %v523_v1, 4  ;;  %v542_v62 = vrot.slane %v540_v39, 5  ;;  %v739_v1 = vsel %vm4042_vm5, %v2766_v35, %v738_v41  ;;  %v550_v54 = vshll.u32 %v4383_v15, 16  ;;  %v3580_v41 = vld [vmem:[%s5196_s1 + $0x1b8] sm:$0xff]  }
  0x77   : > { %1905 = vmatprep.mubr.bf16.mxu1 %v4193_v16  ;;  %v4373_v16 = vcombine.low %v732_v26, %v735_v31  ;;  %v3575_v26 = vld [vmem:[%s5196_s1 + $0x1f0] sm:$0xff]   ;;  %v514_v31 = vrot.slane %v513_v32, 4  ;;  %v536_v32 = vrot.slane %v534_v42, 5  ;;  %v4417_v35 = vcombine.low %v4266_v56, %v4269_v57 }
  0x78   : > { %3262 = vmatprep.subr.bf16.mxu1 %v3575_v26  ;;  %v546_v26 = vrot.slane %v544_v30, 4  ;;  %v529_v42 = vsel %vm3849_vm2, %v524_v61, %v528_v36  ;;  %v4419_v17 = vcombine.low %v739_v1, %v742_v28  ;;  %v2767_v55 = vrot.slane %v4140_v0, 9 }
  0x79   : > { %v519_v10 = vsel %vm3849_vm2, %v514_v31, %v518_v9  ;;  %v537_v39 = vor.u32 %v536_v32, %v533_v14  ;;  %3263 = vmatpush3.bf16.msra.mxu1 %v3577_v33  ;;  %v747_v31 = vrot.slane %v745_v11, 4  ;;  %v748_v36 = vrot.slane %v4157_v12, 5 }
  0x7a   : > { %1777 = vmatmul.mubr.bf16.gmra.mrb[32].mxu0 %v4371_v5  ;;  %v547_v4 = vor.u32 %v546_v26, %v542_v62  ;;  %3264 = vmatprep.subr.bf16.mxu1 %v3578_v49  ;;  %v4422_v9 = vcombine.low %v519_v10, %v529_v42  ;;  %v552_v61 = vrot.slane %v550_v54, 5  ;;  %v746_v0 = vsel %vm4042_vm5, %v2767_v55, %v745_v11 }
  0x7b   : > { %1784 = vmatprep.mubr.bf16.mxu0 %v4380_v19  ;;  %v538_v14 = vrot.slane %v537_v39, 4  ;;  %v749_v33 = vsel %vm4042_vm5, %v747_v31, %v748_v36  ;;  %v752_v12 = vrot.slane %v4201_v20, 5  ;;  %v4440_v32 = vcombine.low %v4310_v59, %v4318_v43 }
  0x7c   : > { %v548_v30 = vrot.slane %v547_v4, 4  ;;  %v4442_v49 = vcombine.low %v746_v0, %v749_v33  ;;  %v2768_v1 = vrot.slane %v4198_v18, 9  ;;  %v755_v26 = vrot.slane %v4210_v25, 5 }
  0x7d   : > { %3265 = vmatpush3.bf16.msra.mxu1 %v3580_v41  ;;  %v543_v4 = vsel %vm3849_vm2, %v538_v14, %v542_v62  ;;  %v754_v28 = vrot.slane %v752_v12, 4  ;;  %v759_v18 = vrot.slane %v4227_v44, 5  ;;  %v4459_v10 = vcombine.low %v4347_v51, %v4358_v38  ;;  %v3573_v14 = vld [vmem:[%s5196_s1 + $0x208] sm:$0xff]  }
  0x7e   : > { %1906 = vmatmul.mubr.bf16.gmra.mrb[32].mxu1 %v4373_v16  ;;  %v553_v54 = vsel %vm3849_vm2, %v548_v30, %v552_v61  ;;  %v753_v20 = vsel %vm4042_vm5, %v2768_v1, %v752_v12  ;;  %v2769_v42 = vrot.slane %v4222_v2, 9  ;;  %v762_v41 = vrot.slane %v4258_v48, 5  ;;  %v3582_v12 = vld [vmem:[%s5196_s1 + $0x220] sm:$0xff]  }
  0x7f   : > { %1913 = vmatprep.mubr.bf16.mxu1 %v4238_v58  ;;  %v4445_v11 = vcombine.low %v543_v4, %v553_v54  ;;  %v756_v62 = vsel %vm4042_vm5, %v754_v28, %v755_v26  ;;  %v761_v39 = vrot.slane %v759_v18, 4  ;;  %v766_v31 = vrot.slane %v4269_v57, 5  ;;  %v3587_v26 = vld [vmem:[%s3804_s6 + $0x94] sm:$0xf] }
  0x80   : > { %v4461_v25 = vcombine.low %v753_v20, %v756_v62  ;;  %v760_v44 = vsel %vm4042_vm5, %v2769_v42, %v759_v18  ;;  %v2770_v48 = vrot.slane %v4266_v56, 9  ;;  %v769_v61 = vrot.slane %v4294_v27, 5  ;;  %v3576_v27 = vld [vmem:[%s5196_s1 + $0x210] sm:$0xff]  }
  0x81   : > { %v763_v55 = vsel %vm4042_vm5, %v761_v39, %v762_v41  ;;  %v768_v36 = vrot.slane %v766_v31, 4  ;;  %v773_v57 = vrot.slane %v4318_v43, 5  ;;  %v776_v0 = vrot.slane %v4336_v13, 5  ;;  %v3579_v43 = vld [vmem:[%s5196_s1 + $0x218] sm:$0xff]   ;;  %v3584_v62 = vld [vmem:[%s5196_s1 + $0x230] sm:$0xff]  }
  0x82   : > { %1785 = vmatmul.mubr.bf16.gmra.mrb[36].mxu0 %v4417_v35  ;;  %v4474_v2 = vcombine.low %v760_v44, %v763_v55  ;;  %v780_v33 = vrot.slane %v4358_v38, 5  ;;  %v2772_v54 = vrot.slane %v4347_v51, 9  ;;  %v783_v28 = vrot.slane %v4383_v15, 5  ;;  %v3583_v38 = vld [vmem:[%s5196_s1 + $0x228] sm:$0xff]   ;;  %v3588_v42 = vld [vmem:[%s3804_s6 + $0x90] sm:$0xf] }
  0x83   : > { %1792 = vmatprep.mubr.bf16.mxu0 %v4422_v9  ;;  %v770_v56 = vsel %vm4042_vm5, %v768_v36, %v769_v61  ;;  %v775_v30 = vrot.slane %v773_v57, 4  ;;  %v787_v20 = vrot.slane %v3587_v26, 5  ;;  %v2773_v39 = vrot.slane %v3588_v42, 9  ;;  %v3589_v44 = vld [vmem:[%s3804_s6 + $0x98] sm:$0x1] }
  0x84   : > { %v782_v1 = vrot.slane %v780_v33, 4  ;;  %v781_v51 = vsel %vm4042_vm5, %v2772_v54, %v780_v33  ;;  %v790_v55 = vrot.slane %v3589_v44, 5  ;;  %v3590_v61 = vld [vmem:[%s3804_s6 + $0xa0] sm:$0xf]  ;;  %v3596_v26 = vld [vmem:[%s3804_s6 + $0xb8] sm:$0xf] }
  0x85   : > { %v777_v13 = vsel %vm4042_vm5, %v775_v30, %v776_v0  ;;  %v789_v41 = vrot.slane %v787_v20, 4  ;;  %v258_v42 = vld [vmem:[%s3804_s6 + $0xc4] sm:$0xf]  ;;  %v3597_v44 = vld [vmem:[%s3804_s6 + $0xb4] sm:$0xf] }
  0x86   : > { %1914 = vmatmul.mubr.bf16.gmra.mrb[36].mxu1 %v4419_v17  ;;  %v784_v15 = vsel %vm4042_vm5, %v782_v1, %v783_v28  ;;  %v3595_v28 = vld [vmem:[%s3804_s6 + $0xb0] sm:$0x1] }
  0x87   : > { %1921 = vmatprep.mubr.bf16.mxu1 %v4306_v47  ;;  %v4532_v18 = vcombine.low %v781_v51, %v784_v15  ;;  %v791_v36 = vsel %vm4042_vm5, %v789_v41, %v790_v55  ;;  %v2776_v55 = vrot.slane %v3597_v44, 9 }
  0x8a   : > { %1793 = vmatmul.mubr.bf16.gmra.mrb[40].mxu0 %v4440_v32 }
  0x8b   : > { %1800 = vmatprep.mubr.bf16.mxu0 %v4445_v11 }
  0x8e   : > { %1922 = vmatmul.mubr.bf16.gmra.mrb[40].mxu1 %v4442_v49 }
  0x8f   : > { %1929 = vmatprep.mubr.bf16.mxu1 %v4371_v5 }
  0x92   : > { %1801 = vmatmul.mubr.bf16.gmra.mrb[44].mxu0 %v4459_v10 }
  0x93   : > { %2034 = vmatprep.mubr.bf16.mxu0 %v4195_v6  ;;  %v767_v6 = vsel %vm4042_vm5, %v2770_v48, %v766_v31  ;;  %v3585_v31 = vld [vmem:[%s5196_s1 + $0x238] sm:$0xff]   ;;  %v788_v48 = vsel %vm4042_vm5, %v2773_v39, %v787_v20  ;;  %v808_v20 = vrot.slane %v3596_v26, 5 }
  0x96   : > { %1930 = vmatmul.mubr.bf16.gmra.mrb[44].mxu1 %v4461_v25 }
  0x97   : > { %1937 = vmatprep.mubr.bf16.mxu1 %v4417_v35 }
  0x9a   : > { %2035 = vmatmul.mubr.bf16.vlgmr.msra.gmra.mrb[48].mxu0 %v3930_v52  ;;  %v4494_v52 = vcombine.low %v767_v6, %v770_v56  ;;  %v4548_v6 = vcombine.low %v788_v48, %v791_v36  ;;  %v3591_v56 = vld [vmem:[%s3804_s6 + $0x9c] sm:$0xf] }
  0x9b   : > { %3387 = vmatpush3.bf16.msra.mxu0 %v4333_v21  ;;  %2042 = vmatprep.mubr.bf16.mxu0 %v4262_v34  ;;  %v2771_v21 = vrot.slane %v4310_v59, 9  ;;  %v3598_v48 = vld [vmem:[%s3804_s6 + $0xbc] sm:$0x1] }
  0x9c   : > { %3388 = vmatprep.subr.bf16.mxu0 %v3573_v14  ;;  %v811_v36 = vrot.slane %v3598_v48, 5 }
  0x9d   : > { %v774_v59 = vsel %vm4042_vm5, %v2771_v21, %v773_v57  ;;  %v2774_v57 = vrot.slane %v3591_v56, 9  ;;  %v3592_v21 = vld [vmem:[%s3804_s6 + $0xa4] sm:$0x1] }
  0x9e   : > { %1938 = vmatmul.mubr.bf16.gmra.mrb[48].mxu1 %v4474_v2  ;;  %v4513_v4 = vcombine.low %v774_v59, %v777_v13  ;;  %v797_v30 = vrot.slane %v3592_v21, 5  ;;  %v3593_v59 = vld [vmem:[%s3804_s6 + $0xac] sm:$0xf] }
  0x9f   : > { %1945 = vmatprep.mubr.bf16.mxu1 %v4440_v32  ;;  %3389 = vmatpush3.bf16.msra.mxu0 %v3573_v14  ;;  %v794_v14 = vrot.slane %v3590_v61, 5  ;;  %v801_v13 = vrot.slane %v3593_v59, 5  ;;  %v809_v61 = vsel %vm4042_vm5, %v2776_v55, %v808_v20 }
  0xa0   : > { %3390 = vmatprep.subr.bf16.mxu0 %v3576_v27 }
  0xa1   : > { %v795_v0 = vsel %vm4042_vm5, %v2774_v57, %v794_v14  ;;  %v803_v1 = vrot.slane %v801_v13, 4  ;;  %v5224_v57 = vld [vmem:[#allocation11_spill] sm:$0xff] }
  0xa2   : > { %2043 = vmatmul.mubr.bf16.gmra.mrb[52].mxu0 %v4003_v63 }
  0xa3   : > { %2050 = vmatprep.mubr.bf16.mxu0 %v4323_v29  ;;  %3391 = vmatpush3.bf16.msra.mxu0 %v3576_v27  ;;  %v796_v27 = vrot.slane %v794_v14, 4 }
  0xa4   : > { %3392 = vmatprep.subr.bf16.mxu0 %v3579_v43 }
  0xa6   : > { %1946 = vmatmul.mubr.bf16.gmra.mrb[52].mxu1 %v4494_v52 }
  0xa7   : > { %1953 = vmatprep.mubr.bf16.mxu1 %v4459_v10  ;;  %3393 = vmatpush3.bf16.msra.mxu0 %v3579_v43  ;;  %v798_v43 = vsel %vm4042_vm5, %v796_v27, %v797_v30  ;;  %v5225_v27 = vld [vmem:[#allocation13_spill] sm:$0xff]  ;;  %v827_v30 = vshrl.u32 %v258_v42, 16 }
  0xa8   : > { %3394 = vmatprep.subr.bf16.mxu0 %v3582_v12  ;;  %v4561_v33 = vcombine.low %v795_v0, %v798_v43  ;;  %v823_v0 = vshll.u32 %v258_v42, 16  ;;  %v259_v43 = vld [vmem:[%s3804_s6 + $0xc8] sm:$0x1] }
  0xa9   : > { %v833_v26 = vshll.u32 %v259_v43, 16 }
  0xaa   : > { %2051 = vmatmul.mubr.bf16.gmra.mrb[56].mxu0 %v4064_v8 }
  0xab   : > { %2058 = vmatprep.mubr.bf16.mxu0 %v4373_v16  ;;  %3395 = vmatpush3.bf16.msra.mxu0 %v3582_v12  ;;  %v3594_v12 = vld [vmem:[%s3804_s6 + $0xa8] sm:$0xf] }
  0xac   : > { %3396 = vmatprep.subr.bf16.mxu0 %v3583_v38  ;;  %v2775_v54 = vrot.slane %v3594_v12, 9 }
  0xae   : > { %1954 = vmatmul.mubr.bf16.gmra.mrb[56].mxu1 %v4513_v4  ;;  %v802_v51 = vsel %vm4042_vm5, %v2775_v54, %v801_v13 }
  0xaf   : > { %1961 = vmatprep.mubr.bf16.mxu1 %v3896_v7  ;;  %3397 = vmatpush3.bf16.msra.mxu0 %v3583_v38  ;;  %v804_v38 = vrot.slane %v3595_v28, 5  ;;  %v829_v28 = vrot.slane %v827_v30, 4 }
  0xb0   : > { %3398 = vmatprep.subr.bf16.mxu0 %v3584_v62 }
  0xb1   : > { %v805_v15 = vsel %vm4042_vm5, %v803_v1, %v804_v38  ;;  %v845_v1 = vrot.slane %v259_v43, 5  ;;  %v5229_v38 = vld [vmem:[#allocation10_spill] sm:$0xff] }
  0xb2   : > { %2059 = vmatmul.mubr.bf16.gmra.mrb[60].mxu0 %v4162_v24  ;;  %v4576_v39 = vcombine.low %v802_v51, %v805_v15 }
  0xb3   : > { %2066 = vmatprep.mubr.bf16.mxu0 %v4419_v17  ;;  %3399 = vmatpush3.bf16.msra.mxu0 %v3584_v62  ;;  %v257_v62 = vld [vmem:[%s3804_s6 + $0xc0] sm:$0xf] }
  0xb4   : > { %3400 = vmatprep.subr.bf16.mxu0 %v3585_v31  ;;  %v4578_v41 = vcombine.low %v257_v62, %v258_v42  ;;  %v817_v21 = vshll.u32 %v257_v62, 16  ;;  %v2777_v59 = vrot.slane %v257_v62, 9 }
  0xb6   : > { %1962 = vmatmul.mubr.bf16.gmra.mrb[60].mxu1 %v4532_v18  ;;  %v819_v12 = vrot.slane %v817_v21, 5  ;;  %v5230_v21 = vld [vmem:[#allocation12_spill] sm:$0xff] }
  0xb7   : > { %1969 = vmatprep.mubr.bf16.mxu1 %v3955_v3  ;;  %3401 = vmatpush3.bf16.msra.mxu0 %v3585_v31  ;;  %v810_v31 = vrot.slane %v808_v20, 4 }
  0xb9   : > { %v812_v14 = vsel %vm4042_vm5, %v810_v31, %v811_v36 }
  0xba   : > { %2067 = vmatmul.mubr.bf16.gmra.mrb[64].mxu0 %v4206_v22  ;;  %v4590_v56 = vcombine.low %v809_v61, %v812_v14  ;;  %v835_v14 = vrot.slane %v833_v26, 5 }
  0xbb   : > { %2074 = vmatprep.mubr.bf16.mxu0 %v4442_v49 }
  0xbe   : > { %1970 = vmatmul.mubr.bf16.gmra.mrb[64].mxu1 %v4548_v6 }
  0xbf   : > { %1977 = vmatprep.mubr.bf16.mxu1 %v3985_v46 }
  0xc2   : > { %2075 = vmatmul.mubr.bf16.gmra.mrb[68].mxu0 %v4234_v53 }
  0xc3   : > { %2082 = vmatprep.mubr.bf16.mxu0 %v4461_v25 }
  0xc6   : > { %1978 = vmatmul.mubr.bf16.gmra.mrb[68].mxu1 %v4561_v33 }
  0xc7   : > { %1985 = vmatprep.mubr.bf16.mxu1 %v4110_v23 }
  0xca   : > { %2083 = vmatmul.mubr.bf16.gmra.mrb[72].mxu0 %v4278_v50 }
  0xcb   : > { %2090 = vmatprep.mubr.bf16.mxu0 %v4474_v2 }
  0xce   : > { %1986 = vmatmul.mubr.bf16.gmra.mrb[72].mxu1 %v4576_v39 }
  0xcf   : > { %1993 = vmatprep.mubr.bf16.mxu1 %v4578_v41 }
  0xd2   : > { %2091 = vmatmul.mubr.bf16.gmra.mrb[76].mxu0 %v4328_v60 }
  0xd3   : > { %2098 = vmatprep.mubr.bf16.mxu0 %v4494_v52 }
  0xd6   : > { %1994 = vmatmul.mubr.bf16.gmra.mrb[76].mxu1 %v4590_v56 }
  0xd7   : > { %2195 = vmatprep.mubr.bf16.mxu1 %v4003_v63  ;;  %v5227_v63 = vld [vmem:[#allocation14_spill] sm:$0xff] }
  0xda   : > { %2099 = vmatmul.mubr.bf16.gmra.mrb[80].mxu0 %v4380_v19 }
  0xdb   : > { %2106 = vmatprep.mubr.bf16.mxu0 %v4513_v4 }
  0xde   : > { %2196 = vmatmul.mubr.bf16.vlgmr.msra.gmra.mrb[80].mxu1 %v3983_v45  ;;  %v5226_v45 = vld [vmem:[#allocation8_spill] sm:$0xff] }
  0xdf   : > { %2203 = vmatprep.mubr.bf16.mxu1 %v4064_v8  ;;  %v814_v8 = vshrl.u32 %v257_v62, 16 }
  0xe1   : > { %v816_v13 = vrot.slane %v814_v8, 4 }
  0xe2   : > { %2107 = vmatmul.mubr.bf16.gmra.mrb[84].mxu0 %v4422_v9 }
  0xe3   : > { %2114 = vmatprep.mubr.bf16.mxu0 %v4532_v18 }
  0xe6   : > { %2204 = vmatmul.mubr.bf16.gmra.mrb[84].mxu1 %v5224_v57 }
  0xe7   : > { %2211 = vmatprep.mubr.bf16.mxu1 %v4162_v24  ;;  %v5228_v24 = vld [vmem:[#allocation9_spill] sm:$0xff] }
  0xea   : > { %2115 = vmatmul.mubr.bf16.gmra.mrb[88].mxu0 %v4445_v11 }
  0xeb   : > { %2122 = vmatprep.mubr.bf16.mxu0 %v4548_v6 }
  0xee   : > { %2212 = vmatmul.mubr.bf16.gmra.mrb[88].mxu1 %v5225_v27 }
  0xef   : > { %2219 = vmatprep.mubr.bf16.mxu1 %v4206_v22  ;;  %v842_v22 = vrot.slane %v258_v42, 5 }
  0xf1   : > { %v844_v54 = vrot.slane %v842_v22, 4 }
  0xf2   : > { %2123 = vmatmul.mubr.bf16.gmra.mrb[92].mxu0 %v5226_v45 }
  0xf3   : > { %2130 = vmatprep.mubr.bf16.mxu0 %v4561_v33  ;;  %v846_v51 = vsel %vm4042_vm5, %v844_v54, %v845_v1 }
  0xf6   : > { %2220 = vmatmul.mubr.bf16.gmra.mrb[92].mxu1 %v5227_v63 }
  0xf7   : > { %2227 = vmatprep.mubr.bf16.mxu1 %v4234_v53  ;;  %v825_v53 = vrot.slane %v823_v0, 5 }
  0xf9   : > { %v830_v15 = vor.u32 %v829_v28, %v825_v53 }
  0xfa   : > { %2131 = vmatmul.mubr.bf16.gmra.mrb[96].mxu0 %v5228_v24 }
  0xfb   : > { %2138 = vmatprep.mubr.bf16.mxu0 %v4576_v39  ;;  %v831_v61 = vrot.slane %v830_v15, 4 }
  0xfe   : > { %2228 = vmatmul.mubr.bf16.gmra.mrb[96].mxu1 %v4238_v58  ;;  %v820_v58 = vor.u32 %v819_v12, %v816_v13 }
  0xff   : > { %2235 = vmatprep.mubr.bf16.mxu1 %v4278_v50  ;;  %v843_v50 = vsel %vm4042_vm5, %v2777_v59, %v842_v22  ;;  %v836_v22 = vsel %vm3849_vm2, %v831_v61, %v835_v14 }
 0x100   : > { %v4625_v55 = vcombine.low %v843_v50, %v846_v51 }
 0x102   : > { %2139 = vmatmul.mubr.bf16.gmra.mrb[100].mxu0 %v5229_v38 }
 0x103   : > { %2146 = vmatprep.mubr.bf16.mxu0 %v4590_v56 }
 0x106   : > { %2236 = vmatmul.mubr.bf16.gmra.mrb[100].mxu1 %v4306_v47  ;;  %v821_v47 = vrot.slane %v820_v58, 4 }
 0x107   : > { %2243 = vmatprep.mubr.bf16.mxu1 %v4328_v60 }
 0x108   : > { %v826_v30 = vsel %vm3849_vm2, %v821_v47, %v825_v53 }
 0x109   : > { %v4643_v43 = vcombine.low %v826_v30, %v836_v22 }
 0x10a   : > { %2147 = vmatmul.mubr.bf16.gmra.mrb[104].mxu0 %v5230_v21 }
 0x10b   : > { %v2930_v20 = vpop.f32.mrb[0].mxu0  ;;  %v3002_v62 = vpop.f32.mrb[0].mxu1  ;;  %2154 = vmatprep.mubr.bf16.mxu0 %v4625_v55 }
 0x10c   : > { %v2931_v42 = vpop.f32.mrb[1].mxu0  ;;  %v3003_v44 = vpop.f32.mrb[1].mxu1 }
 0x10d   : > { %v4627_v31 = vadd.f32 %v2931_v42, %v2930_v20  ;;  %v4629_v48 = vadd.f32 %v3003_v44, %v3002_v62  ;;  %v2933_v60 = vpop.f32.mrb[2].mxu0  ;;  %v3005_v36 = vpop.f32.mrb[2].mxu1 }
 0x10e   : > { %v2934_v57 = vpop.f32.mrb[3].mxu0  ;;  %v3006_v27 = vpop.f32.mrb[3].mxu1  ;;  %2244 = vmatmul.mubr.bf16.gmra.mrb[104].mxu1 %v4371_v5 }
 0x10f   : > { %v4631_v63 = vadd.f32 %v2934_v57, %v2933_v60  ;;  %v4633_v8 = vadd.f32 %v3006_v27, %v3005_v36  ;;  %2251 = vmatprep.mubr.bf16.mxu1 %v4380_v19 }
 0x112   : > { %2155 = vmatmul.mubr.bf16.gmra.mrb[108].mxu0 %v4643_v43 }
 0x113   : > { %v2936_v0 = vpop.f32.mrb[4].mxu0  ;;  %v3008_v54 = vpop.f32.mrb[4].mxu1  ;;  %3402 = vmatprep.mubr.bf16.mxu0 %v4262_v34 }
 0x114   : > { %v2937_v59 = vpop.f32.mrb[5].mxu0  ;;  %v3009_v5 = vpop.f32.mrb[5].mxu1 }
 0x115   : > { %v4645_v13 = vadd.f32 %v2937_v59, %v2936_v0  ;;  %v2939_v12 = vpop.f32.mrb[6].mxu0  ;;  %v4651_v19 = vadd.f32 %v3009_v5, %v3008_v54  ;;  %v3011_v53 = vpop.f32.mrb[6].mxu1 }
 0x116   : > { %v2940_v1 = vpop.f32.mrb[7].mxu0  ;;  %2252 = vmatmul.mubr.bf16.gmra.mrb[108].mxu1 %v4417_v35  ;;  %v3012_v58 = vpop.f32.mrb[7].mxu1 }
 0x117   : > { %v4647_v28 = vadd.f32 %v2940_v1, %v2939_v12  ;;  %2259 = vmatprep.mubr.bf16.mxu1 %v4422_v9  ;;  %v4655_v50 = vadd.f32 %v3012_v58, %v3011_v53 }
 0x11a   : > { %3403 = vmatmul.mubr.bf16.vlgmr.msra.gmra.mrb[112].mxu0 %v4323_v29 }
 0x11b   : > { %v2942_v51 = vpop.f32.mrb[8].mxu0  ;;  %3406 = vmatprep.mubr.bf16.mxu0 %v4373_v16 }
 0x11c   : > { %v2943_v15 = vpop.f32.mrb[9].mxu0 }
 0x11d   : > { %v4659_v26 = vadd.f32 %v2943_v15, %v2942_v51  ;;  %v2945_v20 = vpop.f32.mrb[10].mxu0  ;;  %v3014_v35 = vpop.f32.mrb[8].mxu1  ;;  %v4701_v15 = vld [vmem:[%s3804_s6 + $0xcc] sm:$0xf] }
 0x11e   : > { %2260 = vmatmul.mubr.bf16.gmra.mrb[112].mxu1 %v4440_v32  ;;  %v2946_v62 = vpop.f32.mrb[11].mxu0  ;;  %v3015_v9 = vpop.f32.mrb[9].mxu1 }
 0x11f   : > { %2267 = vmatprep.mubr.bf16.mxu1 %v4445_v11  ;;  %v4663_v42 = vadd.f32 %v2946_v62, %v2945_v20  ;;  %v4665_v34 = vadd.f32 %v3015_v9, %v3014_v35  ;;  %v3017_v44 = vpop.f32.mrb[10].mxu1  ;;  %v4704_v20 = vld [vmem:[%s3804_s6 + $0xd0] sm:$0xf]  ;;  %v851_v35 = vshll.u32 %v4701_v15, 16 }
 0x120   : > { %v3018_v47 = vpop.f32.mrb[11].mxu1  ;;  %v857_v62 = vshll.u32 %v4704_v20, 16  ;;  %v861_v9 = vshrl.u32 %v4704_v20, 16 }
 0x121   : > { %v4667_v60 = vadd.f32 %v3018_v47, %v3017_v44 }
 0x122   : > { %3407 = vmatmul.mubr.bf16.gmra.mrb[116].mxu0 %v4419_v17  ;;  %v4688_v17 = vld [vmem:[%s5197_s2] ss:$0 sm:$0xff] }
 0x123   : > { %v2948_v32 = vpop.f32.mrb[12].mxu0  ;;  %3410 = vmatprep.mubr.bf16.mxu0 %v4442_v49  ;;  %v1718_v5 = vadd.f32 %v4631_v63, %v4688_v17  ;;  %v848_v63 = vshrl.u32 %v4701_v15, 16 }
 0x124   : > { %v2949_v29 = vpop.f32.mrb[13].mxu0 }
 0x125   : > { %v4671_v36 = vadd.f32 %v2949_v29, %v2948_v32  ;;  %v2951_v11 = vpop.f32.mrb[14].mxu0 }
 0x126   : > { %2268 = vmatmul.mubr.bf16.gmra.mrb[116].mxu1 %v4459_v10  ;;  %v2952_v16 = vpop.f32.mrb[15].mxu0 }
 0x127   : > { %2275 = vmatprep.mubr.bf16.mxu1 %v5226_v45  ;;  %v4675_v14 = vadd.f32 %v2952_v16, %v2951_v11 }
 0x129   : > { %v3020_v61 = vpop.f32.mrb[12].mxu1 }
 0x12a   : > { %v3021_v57 = vpop.f32.mrb[13].mxu1  ;;  %3411 = vmatmul.mubr.bf16.gmra.mrb[120].mxu0 %v4461_v25 }
 0x12b   : > { %v4677_v27 = vadd.f32 %v3021_v57, %v3020_v61  ;;  %v3023_v30 = vpop.f32.mrb[14].mxu1  ;;  %3414 = vmatprep.mubr.bf16.mxu0 %v4474_v2  ;;  %v850_v57 = vrot.slane %v848_v63, 4  ;;  %v1731_v63 = vadd.f32 %v4659_v26, %v4688_v17  ;;  %v876_v26 = vrot.slane %v4704_v20, 5 }
 0x12c   : > { %v3024_v22 = vpop.f32.mrb[15].mxu1  ;;  %v2954_v49 = vpop.f32.mrb[16].mxu0 }
 0x12d   : > { %v4679_v10 = vadd.f32 %v3024_v22, %v3023_v30  ;;  %v2955_v0 = vpop.f32.mrb[17].mxu0  ;;  %v853_v30 = vrot.slane %v851_v35, 5  ;;  %v859_v22 = vrot.slane %v857_v62, 5 }
 0x12e   : > { %2276 = vmatmul.mubr.bf16.gmra.mrb[120].mxu1 %v3896_v7  ;;  %v1715_v7 = vadd.f32 %v4627_v31, %v4688_v17  ;;  %v4692_v12 = vadd.f32 %v2955_v0, %v2954_v49  ;;  %v863_v49 = vrot.slane %v861_v9, 4 }
 0x12f   : > { %2283 = vmatprep.mubr.bf16.mxu1 %v5228_v24  ;;  %v2957_v24 = vpop.f32.mrb[18].mxu0 }
 0x130   : > { %v2958_v2 = vpop.f32.mrb[19].mxu0 }
 0x131   : > { %v3042_v45 = vpop.f32.mrb[16].mxu1  ;;  %v4698_v58 = vadd.f32 %v2958_v2, %v2957_v24  ;;  %v854_v24 = vor.u32 %v853_v30, %v850_v57  ;;  %v878_v30 = vrot.slane %v876_v26, 4 }
 0x132   : > { %v3043_v59 = vpop.f32.mrb[17].mxu1  ;;  %3415 = vmatmul.mubr.bf16.gmra.mrb[124].mxu0 %v4494_v52  ;;  %v1723_v52 = vadd.f32 %v4645_v13, %v4688_v17  ;;  %v262_v13 = vld [vmem:[%s3804_s6 + $0xd4] sm:$0x1]  ;;  %s5015_s6 = sand.u32 1, %s3685_s16  }
 0x133   : > { %v3044_v25 = vadd.f32 %v3043_v59, %v3042_v45  ;;  %v3045_v54 = vpop.f32.mrb[18].mxu1  ;;  %3418 = vmatprep.mubr.bf16.mxu0 %v4513_v4  ;;  %v1726_v45 = vadd.f32 %v4647_v28, %v4688_v17  ;;  %v867_v2 = vshll.u32 %v262_v13, 16  ;;  %v1750_v40 = vadd.f32 %v4698_v58, %v4688_v17  ;;  %s2758_s7 = sshll.u32 %s5015_s6, 8  ;;  %s2629_s14 = scalar_lea.sflag [#allocation3], %s5015_s6 }
 0x134   : > { %v3046_v1 = vpop.f32.mrb[19].mxu1  ;;  %s5032_s8 = scalar_lea.vmem [#allocation2], %s2758_s7 }
 0x135   : > { %v4696_v53 = vadd.f32 %v3044_v25, %v1715_v7  ;;  %v3047_v51 = vadd.f32 %v3046_v1, %v3045_v54  ;;  %v2960_v44 = vpop.f32.mrb[20].mxu0  ;;  %v864_v54 = vor.u32 %v863_v49, %v859_v22  ;;  %v879_v49 = vrot.slane %v262_v13, 5  ;;  %s2647_s10 = sshll.u32 %s5032_s8, 4  ;;  %s5119_s10 = int_to_ptr.vmem [resolvable:$true] %s2647_s10 }
 0x136   : > { %2284 = vmatmul.mubr.bf16.gmra.mrb[124].mxu1 %v3955_v3  ;;  %v2961_v32 = vpop.f32.mrb[21].mxu0  ;;  %s3599_s20 = scalar_lea.vmem %s5119_s10, 4096  ;;  %p3606_p0 = scmp.lt.s32.totalorder %s5119_s10, %s3604_s23 }
 0x137   : > { %v4708_v31 = vadd.f32 %v3047_v51, %v1718_v5  ;;  %2291 = vmatprep.mubr.bf16.mxu1 %v5229_v38  ;;  %v4718_v29 = vadd.f32 %v2961_v32, %v2960_v44  ;;  %v2963_v4 = vpop.f32.mrb[22].mxu0  ;;  %v1734_v32 = vadd.f32 %v4663_v42, %v4688_v17  ;;  %p3600_p11 = scmp.ne.s32.totalorder %s5119_s10, %s3599_s20  ;;  %p3607_p1 = scmp.lt.s32.totalorder %s3605_s27, %s3599_s20 }
 0x138   : > { %v2964_v16 = vpop.f32.mrb[23].mxu0 }
 0x139   : > { %v3048_v47 = vpop.f32.mrb[20].mxu1  ;;  %v4724_v59 = vadd.f32 %v2964_v16, %v2963_v4  ;;  %p3601_p12 = pnand %p3600_p11, %p3762_p5  ;;  %p3608_p2 = por %p3607_p1, %p3606_p0 }
 0x13a   : > { %v3049_v3 = vpop.f32.mrb[21].mxu1  ;;  %3419 = vmatmul.mubr.bf16.gmra.mrb[128].mxu0 %v4532_v18 }
 0x13b   : > { %v3050_v38 = vadd.f32 %v3049_v3, %v3048_v47  ;;  %v3051_v11 = vpop.f32.mrb[22].mxu1  ;;  %3422 = vmatprep.mubr.bf16.mxu0 %v4548_v6  ;;  %v865_v47 = vrot.slane %v864_v54, 4  ;;  %v869_v6 = vrot.slane %v867_v2, 5  ;;  %v1742_v2 = vadd.f32 %v4675_v14, %v4688_v17  ;;  %p3602_p13 = pneg %p3601_p12 }
 0x13c   : > { %v3052_v61 = vpop.f32.mrb[23].mxu1  ;;  %v880_v14 = vsel %vm4042_vm5, %v878_v30, %v879_v49  ;;  %v1758_v49 = vadd.f32 %v4724_v59, %v4688_v17 }
 0x13d   : > { %v4722_v0 = vadd.f32 %v3050_v38, %v1723_v52  ;;  %v3053_v7 = vadd.f32 %v3052_v61, %v3051_v11  ;;  %v2966_v28 = vpop.f32.mrb[24].mxu0  ;;  %v870_v11 = vsel %vm3849_vm2, %v865_v47, %v869_v6  ;;  %p3609_p3 = pnand %p3608_p2, %p3602_p13 }
 0x13e   : > { %2292 = vmatmul.mubr.bf16.gmra.mrb[128].mxu1 %v3985_v46  ;;  %v2967_v5 = vpop.f32.mrb[25].mxu0 }
 0x13f   : > { %v4729_v25 = vadd.f32 %v3053_v7, %v1726_v45  ;;  %2299 = vmatprep.mubr.bf16.mxu1 %v5230_v21  ;;  %v4735_v35 = vadd.f32 %v2967_v5, %v2966_v28  ;;  %v2969_v18 = vpop.f32.mrb[26].mxu0  ;;  %v855_v21 = vrot.slane %v854_v24, 4  ;;  %v1739_v45 = vadd.f32 %v4671_v36, %v4688_v17 }
 0x140   : > { %v2970_v9 = vpop.f32.mrb[27].mxu0 }
 0x141   : > { %v3054_v1 = vpop.f32.mrb[24].mxu1  ;;  %v4741_v52 = vadd.f32 %v2970_v9, %v2969_v18  ;;  %v860_v42 = vsel %vm3849_vm2, %v855_v21, %v859_v22 }
 0x142   : > { %v3055_v51 = vpop.f32.mrb[25].mxu1  ;;  %3423 = vmatmul.mubr.bf16.gmra.mrb[132].mxu0 %v4561_v33  ;;  %v2778_v33 = vrot.slane %v4701_v15, 9  ;;  %v2831_v22 = vcombine.low %v860_v42, %v870_v11 }
 0x143   : > { %v3056_v46 = vadd.f32 %v3055_v51, %v3054_v1  ;;  %v3057_v62 = vpop.f32.mrb[26].mxu1  ;;  %3426 = vmatprep.mubr.bf16.mxu0 %v4576_v39 }
 0x144   : > { %v3058_v44 = vpop.f32.mrb[27].mxu1  ;;  %v877_v13 = vsel %vm4042_vm5, %v2778_v33, %v876_v26 }
 0x145   : > { %v4739_v3 = vadd.f32 %v3056_v46, %v1731_v63  ;;  %v3059_v38 = vadd.f32 %v3058_v44, %v3057_v62  ;;  %v2972_v16 = vpop.f32.mrb[28].mxu0  ;;  %v2832_v62 = vcombine.low %v877_v13, %v880_v14 }
 0x146   : > { %2300 = vmatmul.mubr.bf16.gmra.mrb[132].mxu1 %v4110_v23  ;;  %v2973_v57 = vpop.f32.mrb[29].mxu0 }
 0x147   : > { %v4746_v4 = vadd.f32 %v3059_v38, %v1734_v32  ;;  %2307 = vmatprep.mubr.bf16.mxu1 %v4643_v43  ;;  %v4757_v43 = vadd.f32 %v2973_v57, %v2972_v16  ;;  %v2975_v7 = vpop.f32.mrb[30].mxu0  ;;  %v1755_v16 = vadd.f32 %v4718_v29, %v4688_v17 }
 0x148   : > { %v2976_v54 = vpop.f32.mrb[31].mxu0 }
 0x149   : > { %v3060_v61 = vpop.f32.mrb[28].mxu1  ;;  %v4763_v1 = vadd.f32 %v2976_v54, %v2975_v7 }
 0x14a   : > { %v3061_v23 = vpop.f32.mrb[29].mxu1  ;;  %3427 = vmatmul.mubr.bf16.gmra.mrb[136].mxu0 %v4590_v56  ;;  %v1747_v56 = vadd.f32 %v4692_v12, %v4688_v17 }
 0x14b   : > { %v3062_v39 = vadd.f32 %v3061_v23, %v3060_v61  ;;  %v3063_v24 = vpop.f32.mrb[30].mxu1  ;;  %3430 = vmatprep.mubr.bf16.mxu0 %v4625_v55 }
 0x14c   : > { %v3064_v37 = vpop.f32.mrb[31].mxu1 }
 0x14d   : > { %v4761_v28 = vadd.f32 %v3062_v39, %v1739_v45  ;;  %v3065_v5 = vadd.f32 %v3064_v37, %v3063_v24  ;;  %v2978_v51 = vpop.f32.mrb[32].mxu0 }
 0x14e   : > { %2308 = vmatmul.mubr.bf16.gmra.mrb[136].mxu1 %v4578_v41  ;;  %v2979_v46 = vpop.f32.mrb[33].mxu0  ;;  %v2830_v41 = vcombine.low %v4701_v15, %v4704_v20 }
 0x14f   : > { %v4767_v36 = vadd.f32 %v3065_v5, %v1742_v2  ;;  %2315 = vmatprep.mubr.bf16.mxu1 %v2831_v22  ;;  %v4778_v9 = vadd.f32 %v2979_v46, %v2978_v51  ;;  %v2981_v44 = vpop.f32.mrb[34].mxu0  ;;  %v1763_v2 = vadd.f32 %v4735_v35, %v4688_v17  ;;  %v1766_v46 = vadd.f32 %v4741_v52, %v4688_v17 }
 0x150   : > { %v2982_v47 = vpop.f32.mrb[35].mxu0 }
 0x151   : > { %v3066_v63 = vpop.f32.mrb[32].mxu1  ;;  %v2983_v38 = vadd.f32 %v2982_v47, %v2981_v44  ;;  %v1771_v47 = vadd.f32 %v4757_v43, %v4688_v17 }
 0x152   : > { %v3067_v18 = vpop.f32.mrb[33].mxu1  ;;  %3431 = vmatmul.mubr.bf16.gmra.mrb[140].mxu0 %v2832_v62 }
 0x153   : > { %v3068_v55 = vadd.f32 %v3067_v18, %v3066_v63  ;;  %v3069_v21 = vpop.f32.mrb[34].mxu1 }
 0x154   : > { %v3070_v6 = vpop.f32.mrb[35].mxu1 }
 0x155   : > { %v4782_v32 = vadd.f32 %v3068_v55, %v1747_v56  ;;  %v3071_v26 = vadd.f32 %v3070_v6, %v3069_v21  ;;  %v2984_v20 = vpop.f32.mrb[36].mxu0 }
 0x156   : > { %2316 = vmatmul.mubr.bf16.gmra.mrb[140].mxu1 %v2830_v41  ;;  %v2985_v42 = vpop.f32.mrb[37].mxu0 }
 0x157   : > { %v4784_v15 = vadd.f32 %v3071_v26, %v1750_v40  ;;  %v4788_v61 = vadd.f32 %v2985_v42, %v2984_v20  ;;  %v2987_v23 = vpop.f32.mrb[38].mxu0  ;;  %v1774_v42 = vadd.f32 %v4763_v1, %v4688_v17  ;;  %v1782_v1 = vadd.f32 %v2983_v38, %v4688_v17 }
 0x158   : > { %v2988_v33 = vpop.f32.mrb[39].mxu0 }
 0x159   : > { %v3072_v12 = vpop.f32.mrb[36].mxu1  ;;  %v2989_v39 = vadd.f32 %v2988_v33, %v2987_v23  ;;  %v1787_v38 = vadd.f32 %v4788_v61, %v4688_v17 }
 0x15a   : > { %v3073_v11 = vpop.f32.mrb[37].mxu1 }
 0x15b   : > { %v3074_v57 = vadd.f32 %v3073_v11, %v3072_v12  ;;  %v3075_v58 = vpop.f32.mrb[38].mxu1 }
 0x15c   : > { %v3076_v30 = vpop.f32.mrb[39].mxu1 }
 0x15d   : > { %v4792_v45 = vadd.f32 %v3074_v57, %v1755_v16  ;;  %v3077_v7 = vadd.f32 %v3076_v30, %v3075_v58  ;;  %v2990_v22 = vpop.f32.mrb[40].mxu0 }
 0x15e   : > { %v2991_v37 = vpop.f32.mrb[41].mxu0 }
 0x15f   : > { %v4794_v24 = vadd.f32 %v3077_v7, %v1758_v49  ;;  %v4798_v5 = vadd.f32 %v2991_v37, %v2990_v22  ;;  %v2993_v14 = vpop.f32.mrb[42].mxu0  ;;  %v1779_v49 = vadd.f32 %v4778_v9, %v4688_v17 }
 0x160   : > { %v2994_v63 = vpop.f32.mrb[43].mxu0 }
 0x161   : > { %v3078_v54 = vpop.f32.mrb[40].mxu1  ;;  %v4804_v41 = vadd.f32 %v2994_v63, %v2993_v14 }
 0x162   : > { %v3079_v29 = vpop.f32.mrb[41].mxu1 }
 0x163   : > { %v3080_v13 = vadd.f32 %v3079_v29, %v3078_v54  ;;  %v3081_v51 = vpop.f32.mrb[42].mxu1 }
 0x164   : > { %v3082_v59 = vpop.f32.mrb[43].mxu1 }
 0x165   : > { %v4802_v18 = vadd.f32 %v3080_v13, %v1763_v2  ;;  %v3083_v62 = vadd.f32 %v3082_v59, %v3081_v51  ;;  %v2996_v55 = vpop.f32.mrb[44].mxu0 }
 0x166   : > { %v2997_v35 = vpop.f32.mrb[45].mxu0 }
 0x167   : > { %v4806_v56 = vadd.f32 %v3083_v62, %v1766_v46  ;;  %v4810_v6 = vadd.f32 %v2997_v35, %v2996_v55  ;;  %v2999_v26 = vpop.f32.mrb[46].mxu0 }
 0x168   : > { %v3000_v52 = vpop.f32.mrb[47].mxu0 }
 0x169   : > { %v3084_v44 = vpop.f32.mrb[44].mxu1  ;;  %v4816_v16 = vadd.f32 %v3000_v52, %v2999_v26 }
 0x16a   : > { %v3085_v21 = vpop.f32.mrb[45].mxu1 }
 0x16b   : > { %v3086_v40 = vadd.f32 %v3085_v21, %v3084_v44  ;;  %v3087_v20 = vpop.f32.mrb[46].mxu1 }
 0x16c   : > { %v3088_v12 = vpop.f32.mrb[47].mxu1 }
 0x16d   : > { %v4814_v11 = vadd.f32 %v3086_v40, %v1771_v47  ;;  %v3089_v57 = vadd.f32 %v3088_v12, %v3087_v20  ;;  %v3154_v33 = vpop.f32.mrb[48].mxu0 }
 0x16e   : > { %v3155_v30 = vpop.f32.mrb[49].mxu0 }
 0x16f   : > { %v4818_v23 = vadd.f32 %v3089_v57, %v1774_v42  ;;  %v3156_v22 = vadd.f32 %v3155_v30, %v3154_v33  ;;  %v3157_v37 = vpop.f32.mrb[50].mxu0 }
 0x170   : > { %v3158_v2 = vpop.f32.mrb[51].mxu0 }
 0x171   : > { %v3090_v58 = vpop.f32.mrb[48].mxu1  ;;  %v4826_v14 = vadd.f32 %v3156_v22, %v4696_v53  ;;  %v3159_v63 = vadd.f32 %v3158_v2, %v3157_v37  ;;  %v1790_v53 = vadd.f32 %v2989_v39, %v4688_v17  ;;  %v1795_v39 = vadd.f32 %v4798_v5, %v4688_v17 }
 0x172   : > { %v3091_v43 = vpop.f32.mrb[49].mxu1 }
 0x173   : > { %v3092_v7 = vadd.f32 %v3091_v43, %v3090_v58  ;;  %v3093_v54 = vpop.f32.mrb[50].mxu1  ;;  %v4831_v46 = vadd.f32 %v3159_v63, %v4708_v31 }
 0x174   : > { %v3094_v29 = vpop.f32.mrb[51].mxu1 }
 0x175   : > { %v4823_v13 = vadd.f32 %v3092_v7, %v1779_v49  ;;  %v3095_v51 = vadd.f32 %v3094_v29, %v3093_v54  ;;  %v3160_v62 = vpop.f32.mrb[52].mxu0 }
 0x176   : > { %v3161_v44 = vpop.f32.mrb[53].mxu0 }
 0x177   : > { %v4828_v59 = vadd.f32 %v3095_v51, %v1782_v1  ;;  %v3162_v21 = vadd.f32 %v3161_v44, %v3160_v62  ;;  %v3163_v40 = vpop.f32.mrb[54].mxu0 }
 0x178   : > { %v3164_v20 = vpop.f32.mrb[55].mxu0 }
 0x179   : > { %v3096_v9 = vpop.f32.mrb[52].mxu1  ;;  %v4839_v31 = vadd.f32 %v3162_v21, %v4722_v0  ;;  %v3165_v42 = vadd.f32 %v3164_v20, %v3163_v40  ;;  %v1798_v0 = vadd.f32 %v4804_v41, %v4688_v17  ;;  %v1803_v41 = vadd.f32 %v4810_v6, %v4688_v17 }
 0x17a   : > { %v3097_v55 = vpop.f32.mrb[53].mxu1 }
 0x17b   : > { %v3098_v35 = vadd.f32 %v3097_v55, %v3096_v9  ;;  %v3099_v47 = vpop.f32.mrb[54].mxu1  ;;  %v4844_v58 = vadd.f32 %v3165_v42, %v4729_v25 }
 0x17c   : > { %v3100_v26 = vpop.f32.mrb[55].mxu1 }
 0x17d   : > { %v4836_v52 = vadd.f32 %v3098_v35, %v1787_v38  ;;  %v3101_v12 = vadd.f32 %v3100_v26, %v3099_v47  ;;  %v3166_v33 = vpop.f32.mrb[56].mxu0 }
 0x17e   : > { %v3167_v30 = vpop.f32.mrb[57].mxu0 }
 0x17f   : > { %v4841_v57 = vadd.f32 %v3101_v12, %v1790_v53  ;;  %v3168_v7 = vadd.f32 %v3167_v30, %v3166_v33  ;;  %v3169_v54 = vpop.f32.mrb[58].mxu0 }
 0x180   : > { %v3170_v1 = vpop.f32.mrb[59].mxu0 }
 0x181   : > { %v3102_v61 = vpop.f32.mrb[56].mxu1  ;;  %v4853_v25 = vadd.f32 %v3168_v7, %v4739_v3  ;;  %v3171_v51 = vadd.f32 %v3170_v1, %v3169_v54  ;;  %v1806_v3 = vadd.f32 %v4816_v16, %v4688_v17  ;;  %v1811_v16 = vadd.f32 %v4629_v48, %v4688_v17 }
 0x182   : > { %v3103_v43 = vpop.f32.mrb[57].mxu1 }
 0x183   : > { %v3104_v49 = vadd.f32 %v3103_v43, %v3102_v61  ;;  %v3105_v22 = vpop.f32.mrb[58].mxu1  ;;  %v4858_v5 = vadd.f32 %v3171_v51, %v4746_v4 }
 0x184   : > { %v3106_v37 = vpop.f32.mrb[59].mxu1 }
 0x185   : > { %v4850_v29 = vadd.f32 %v3104_v49, %v1795_v39  ;;  %v3107_v2 = vadd.f32 %v3106_v37, %v3105_v22  ;;  %v3172_v62 = vpop.f32.mrb[60].mxu0 }
 0x186   : > { %v3173_v44 = vpop.f32.mrb[61].mxu0 }
 0x187   : > { %v4855_v63 = vadd.f32 %v3107_v2, %v1798_v0  ;;  %v3174_v35 = vadd.f32 %v3173_v44, %v3172_v62  ;;  %v3175_v47 = vpop.f32.mrb[62].mxu0 }
 0x188   : > { %v3176_v53 = vpop.f32.mrb[63].mxu0 }
 0x189   : > { %v3108_v9 = vpop.f32.mrb[60].mxu1  ;;  %v4867_v4 = vadd.f32 %v3174_v35, %v4761_v28  ;;  %v3177_v12 = vadd.f32 %v3176_v53, %v3175_v47  ;;  %v1814_v28 = vadd.f32 %v4633_v8, %v4688_v17  ;;  %v1819_v8 = vadd.f32 %v4651_v19, %v4688_v17 }
 0x18a   : > { %v3109_v55 = vpop.f32.mrb[61].mxu1 }
 0x18b   : > { %v3110_v38 = vadd.f32 %v3109_v55, %v3108_v9  ;;  %v3111_v21 = vpop.f32.mrb[62].mxu1  ;;  %v4872_v6 = vadd.f32 %v3177_v12, %v4767_v36 }
 0x18c   : > { %v3112_v40 = vpop.f32.mrb[63].mxu1 }
 0x18d   : > { %v4864_v26 = vadd.f32 %v3110_v38, %v1803_v41  ;;  %v3113_v20 = vadd.f32 %v3112_v40, %v3111_v21  ;;  %v3178_v33 = vpop.f32.mrb[64].mxu0 }
 0x18e   : > { %v3179_v30 = vpop.f32.mrb[65].mxu0 }
 0x18f   : > { %v4869_v42 = vadd.f32 %v3113_v20, %v1806_v3  ;;  %v3180_v49 = vadd.f32 %v3179_v30, %v3178_v33  ;;  %v3181_v22 = vpop.f32.mrb[66].mxu0 }
 0x190   : > { %v3182_v0 = vpop.f32.mrb[67].mxu0 }
 0x191   : > { %v3114_v61 = vpop.f32.mrb[64].mxu1  ;;  %v4881_v36 = vadd.f32 %v3180_v49, %v4782_v32  ;;  %v3183_v2 = vadd.f32 %v3182_v0, %v3181_v22  ;;  %v1822_v32 = vadd.f32 %v4655_v50, %v4688_v17  ;;  %v1827_v50 = vadd.f32 %v4665_v34, %v4688_v17 }
 0x192   : > { %v3115_v43 = vpop.f32.mrb[65].mxu1 }
 0x193   : > { %v3116_v39 = vadd.f32 %v3115_v43, %v3114_v61  ;;  %v3117_v7 = vpop.f32.mrb[66].mxu1  ;;  %v4886_v48 = vadd.f32 %v3183_v2, %v4784_v15 }
 0x194   : > { %v3118_v54 = vpop.f32.mrb[67].mxu1 }
 0x195   : > { %v4878_v37 = vadd.f32 %v3116_v39, %v1811_v16  ;;  %v3119_v1 = vadd.f32 %v3118_v54, %v3117_v7  ;;  %v3184_v62 = vpop.f32.mrb[68].mxu0 }
 0x196   : > { %v3185_v44 = vpop.f32.mrb[69].mxu0 }
 0x197   : > { %v4883_v51 = vadd.f32 %v3119_v1, %v1814_v28  ;;  %v3186_v38 = vadd.f32 %v3185_v44, %v3184_v62  ;;  %v3187_v21 = vpop.f32.mrb[70].mxu0 }
 0x198   : > { %v3188_v3 = vpop.f32.mrb[71].mxu0 }
 0x199   : > { %v3120_v9 = vpop.f32.mrb[68].mxu1  ;;  %v4895_v15 = vadd.f32 %v3186_v38, %v4792_v45  ;;  %v3189_v20 = vadd.f32 %v3188_v3, %v3187_v21  ;;  %v1830_v45 = vadd.f32 %v4667_v60, %v4688_v17  ;;  %v1835_v60 = vadd.f32 %v4677_v27, %v4688_v17 }
 0x19a   : > { %v3121_v55 = vpop.f32.mrb[69].mxu1 }
 0x19b   : > { %v3122_v41 = vadd.f32 %v3121_v55, %v3120_v9  ;;  %v3123_v35 = vpop.f32.mrb[70].mxu1  ;;  %v4900_v19 = vadd.f32 %v3189_v20, %v4794_v24 }
 0x19c   : > { %v3124_v47 = vpop.f32.mrb[71].mxu1 }
 0x19d   : > { %v4892_v40 = vadd.f32 %v3122_v41, %v1819_v8  ;;  %v3125_v53 = vadd.f32 %v3124_v47, %v3123_v35  ;;  %v3190_v33 = vpop.f32.mrb[72].mxu0 }
 0x19e   : > { %v3191_v30 = vpop.f32.mrb[73].mxu0 }
 0x19f   : > { %v4897_v12 = vadd.f32 %v3125_v53, %v1822_v32  ;;  %v3192_v39 = vadd.f32 %v3191_v30, %v3190_v33  ;;  %v3193_v7 = vpop.f32.mrb[74].mxu0 }
 0x1a0   : > { %v3194_v28 = vpop.f32.mrb[75].mxu0 }
 0x1a1   : > { %v3126_v61 = vpop.f32.mrb[72].mxu1  ;;  %v4909_v24 = vadd.f32 %v3192_v39, %v4802_v18  ;;  %v3195_v1 = vadd.f32 %v3194_v28, %v3193_v7  ;;  %v1838_v18 = vadd.f32 %v4679_v10, %v4688_v17 }
 0x1a2   : > { %v3127_v43 = vpop.f32.mrb[73].mxu1 }
 0x1a3   : > { %v3128_v16 = vadd.f32 %v3127_v43, %v3126_v61  ;;  %v3129_v49 = vpop.f32.mrb[74].mxu1  ;;  %v4914_v34 = vadd.f32 %v3195_v1, %v4806_v56 }
 0x1a4   : > { %v3130_v22 = vpop.f32.mrb[75].mxu1 }
 0x1a5   : > { %v4906_v54 = vadd.f32 %v3128_v16, %v1827_v50  ;;  %v3131_v0 = vadd.f32 %v3130_v22, %v3129_v49  ;;  %v3196_v62 = vpop.f32.mrb[76].mxu0 }
 0x1a6   : > { %v3197_v44 = vpop.f32.mrb[77].mxu0 }
 0x1a7   : > { %v4911_v2 = vadd.f32 %v3131_v0, %v1830_v45  ;;  %v3198_v41 = vadd.f32 %v3197_v44, %v3196_v62  ;;  %v3199_v35 = vpop.f32.mrb[78].mxu0 }
 0x1a8   : > { %v3200_v32 = vpop.f32.mrb[79].mxu0 }
 0x1a9   : > { %v3132_v9 = vpop.f32.mrb[76].mxu1  ;;  %v4923_v56 = vadd.f32 %v3198_v41, %v4814_v11  ;;  %v3201_v53 = vadd.f32 %v3200_v32, %v3199_v35 }
 0x1aa   : > { %v3133_v55 = vpop.f32.mrb[77].mxu1 }
 0x1ab   : > { %v3134_v8 = vadd.f32 %v3133_v55, %v3132_v9  ;;  %v3135_v38 = vpop.f32.mrb[78].mxu1  ;;  %v4928_v27 = vadd.f32 %v3201_v53, %v4818_v23 }
 0x1ac   : > { %v3136_v21 = vpop.f32.mrb[79].mxu1 }
 0x1ad   : > { %v4920_v47 = vadd.f32 %v3134_v8, %v1835_v60  ;;  %v3137_v3 = vadd.f32 %v3136_v21, %v3135_v38  ;;  %v3202_v61 = vpop.f32.mrb[80].mxu0 }
 0x1ae   : > { %v3203_v43 = vpop.f32.mrb[81].mxu0 }
 0x1af   : > { %v4925_v20 = vadd.f32 %v3137_v3, %v1838_v18  ;;  %v3204_v50 = vadd.f32 %v3203_v43, %v3202_v61  ;;  %v3205_v17 = vpop.f32.mrb[82].mxu0 }
 0x1b0   : > { %v3206_v39 = vpop.f32.mrb[83].mxu0 }
 0x1b1   : > { %v3266_v33 = vpop.f32.mrb[80].mxu1  ;;  %v4931_v11 = vadd.f32 %v3204_v50, %v4823_v13  ;;  %v3207_v7 = vadd.f32 %v3206_v39, %v3205_v17 }
 0x1b2   : > { %v3267_v30 = vpop.f32.mrb[81].mxu1 }
 0x1b3   : > { %v3268_v10 = vadd.f32 %v3267_v30, %v3266_v33  ;;  %v3269_v16 = vpop.f32.mrb[82].mxu1  ;;  %v4937_v23 = vadd.f32 %v3207_v7, %v4828_v59 }
 0x1b4   : > { %v3270_v49 = vpop.f32.mrb[83].mxu1 }
 0x1b5   : > { %v3271_v45 = vadd.f32 %v3270_v49, %v3269_v16  ;;  %v4934_v22 = vadd.f32 %v3268_v10, %v4826_v14  ;;  %v3208_v0 = vpop.f32.mrb[84].mxu0 }
 0x1b6   : > { %v3209_v9 = vpop.f32.mrb[85].mxu0 }
 0x1b7   : > { %v4940_v28 = vadd.f32 %v3271_v45, %v4831_v46  ;;  %v3210_v55 = vadd.f32 %v3209_v9, %v3208_v0  ;;  %v3211_v60 = vpop.f32.mrb[86].mxu0 }
 0x1b8   : > { %v3212_v8 = vpop.f32.mrb[87].mxu0 }
 0x1b9   : > { %v3272_v1 = vpop.f32.mrb[84].mxu1  ;;  %v4943_v38 = vadd.f32 %v3210_v55, %v4836_v52  ;;  %v3213_v14 = vadd.f32 %v3212_v8, %v3211_v60 }
 0x1ba   : > { %v3273_v62 = vpop.f32.mrb[85].mxu1 }
 0x1bb   : > { %v3274_v44 = vadd.f32 %v3273_v62, %v3272_v1  ;;  %v3275_v13 = vpop.f32.mrb[86].mxu1  ;;  %v4949_v46 = vadd.f32 %v3213_v14, %v4841_v57 }
 0x1bc   : > { %v3276_v41 = vpop.f32.mrb[87].mxu1 }
 0x1bd   : > { %v3277_v35 = vadd.f32 %v3276_v41, %v3275_v13  ;;  %v4946_v59 = vadd.f32 %v3274_v44, %v4839_v31  ;;  %v3214_v21 = vpop.f32.mrb[88].mxu0 }
 0x1be   : > { %v3215_v3 = vpop.f32.mrb[89].mxu0 }
 0x1bf   : > { %v4952_v18 = vadd.f32 %v3277_v35, %v4844_v58  ;;  %v3216_v61 = vadd.f32 %v3215_v3, %v3214_v21  ;;  %v3217_v43 = vpop.f32.mrb[90].mxu0 }
 0x1c0   : > { %v3218_v30 = vpop.f32.mrb[91].mxu0 }
 0x1c1   : > { %v3278_v32 = vpop.f32.mrb[88].mxu1  ;;  %v4955_v10 = vadd.f32 %v3216_v61, %v4850_v29  ;;  %v3219_v31 = vadd.f32 %v3218_v30, %v3217_v43 }
 0x1c2   : > { %v3279_v53 = vpop.f32.mrb[89].mxu1 }
 0x1c3   : > { %v3280_v33 = vadd.f32 %v3279_v53, %v3278_v32  ;;  %v3281_v52 = vpop.f32.mrb[90].mxu1  ;;  %v4961_v58 = vadd.f32 %v3219_v31, %v4855_v63 }
 0x1c4   : > { %v3282_v50 = vpop.f32.mrb[91].mxu1 }
 0x1c5   : > { %v3283_v17 = vadd.f32 %v3282_v50, %v3281_v52  ;;  %v4958_v57 = vadd.f32 %v3280_v33, %v4853_v25  ;;  %v3220_v39 = vpop.f32.mrb[92].mxu0 }
 0x1c6   : > { %v3221_v7 = vpop.f32.mrb[93].mxu0 }
 0x1c7   : > { %v4964_v16 = vadd.f32 %v3283_v17, %v4858_v5  ;;  %v3222_v0 = vadd.f32 %v3221_v7, %v3220_v39  ;;  %v3223_v9 = vpop.f32.mrb[94].mxu0 }
 0x1c8   : > { %v3224_v62 = vpop.f32.mrb[95].mxu0 }
 0x1c9   : > { %v3284_v49 = vpop.f32.mrb[92].mxu1  ;;  %v4967_v44 = vadd.f32 %v3222_v0, %v4864_v26  ;;  %v3225_v25 = vadd.f32 %v3224_v62, %v3223_v9 }
 0x1ca   : > { %v3285_v45 = vpop.f32.mrb[93].mxu1 }
 0x1cb   : > { %v3286_v1 = vadd.f32 %v3285_v45, %v3284_v49  ;;  %v3287_v29 = vpop.f32.mrb[94].mxu1  ;;  %v4973_v5 = vadd.f32 %v3225_v25, %v4869_v42 }
 0x1cc   : > { %v3288_v55 = vpop.f32.mrb[95].mxu1 }
 0x1cd   : > { %v3289_v60 = vadd.f32 %v3288_v55, %v3287_v29  ;;  %v4970_v63 = vadd.f32 %v3286_v1, %v4867_v4  ;;  %v3226_v8 = vpop.f32.mrb[96].mxu0 }
 0x1ce   : > { %v3227_v14 = vpop.f32.mrb[97].mxu0 }
 0x1cf   : > { %v4976_v13 = vadd.f32 %v3289_v60, %v4872_v6  ;;  %v3228_v21 = vadd.f32 %v3227_v14, %v3226_v8  ;;  %v3229_v3 = vpop.f32.mrb[98].mxu0 }
 0x1d0   : > { %v3230_v53 = vpop.f32.mrb[99].mxu0 }
 0x1d1   : > { %v3290_v41 = vpop.f32.mrb[96].mxu1  ;;  %v4979_v33 = vadd.f32 %v3228_v21, %v4878_v37  ;;  %v3231_v4 = vadd.f32 %v3230_v53, %v3229_v3 }
 0x1d2   : > { %v3291_v35 = vpop.f32.mrb[97].mxu1 }
 0x1d3   : > { %v3292_v32 = vadd.f32 %v3291_v35, %v3290_v41  ;;  %v3293_v26 = vpop.f32.mrb[98].mxu1  ;;  %v4985_v6 = vadd.f32 %v3231_v4, %v4883_v51 }
 0x1d4   : > { %v3294_v61 = vpop.f32.mrb[99].mxu1 }
 0x1d5   : > { %v3295_v43 = vadd.f32 %v3294_v61, %v3293_v26  ;;  %v4982_v42 = vadd.f32 %v3292_v32, %v4881_v36  ;;  %v3232_v30 = vpop.f32.mrb[100].mxu0 }
 0x1d6   : > { %v3233_v31 = vpop.f32.mrb[101].mxu0 }
 0x1d7   : > { %v4988_v52 = vadd.f32 %v3295_v43, %v4886_v48  ;;  %v3234_v39 = vadd.f32 %v3233_v31, %v3232_v30  ;;  %v3235_v7 = vpop.f32.mrb[102].mxu0 }
 0x1d8   : > { %v3236_v45 = vpop.f32.mrb[103].mxu0 }
 0x1d9   : > { %v3296_v50 = vpop.f32.mrb[100].mxu1  ;;  %v4991_v1 = vadd.f32 %v3234_v39, %v4892_v40  ;;  %v3237_v36 = vadd.f32 %v3236_v45, %v3235_v7 }
 0x1da   : > { %v3297_v17 = vpop.f32.mrb[101].mxu1 }
 0x1db   : > { %v3298_v49 = vadd.f32 %v3297_v17, %v3296_v50  ;;  %v3299_v37 = vpop.f32.mrb[102].mxu1  ;;  %v4997_v48 = vadd.f32 %v3237_v36, %v4897_v12 }
 0x1dc   : > { %v3300_v0 = vpop.f32.mrb[103].mxu1 }
 0x1dd   : > { %v3301_v9 = vadd.f32 %v3300_v0, %v3299_v37  ;;  %v4994_v51 = vadd.f32 %v3298_v49, %v4895_v15  ;;  %v3238_v62 = vpop.f32.mrb[104].mxu0 }
 0x1de   : > { %v3239_v25 = vpop.f32.mrb[105].mxu0 }
 0x1df   : > { %v5000_v29 = vadd.f32 %v3301_v9, %v4900_v19  ;;  %v3240_v8 = vadd.f32 %v3239_v25, %v3238_v62  ;;  %v3241_v14 = vpop.f32.mrb[106].mxu0 }
 0x1e0   : > { %v3242_v35 = vpop.f32.mrb[107].mxu0 }
 0x1e1   : > { %v3302_v55 = vpop.f32.mrb[104].mxu1  ;;  %v5003_v15 = vadd.f32 %v3240_v8, %v4906_v54  ;;  %v3243_v32 = vadd.f32 %v3242_v35, %v3241_v14 }
 0x1e2   : > { %v3303_v60 = vpop.f32.mrb[105].mxu1 }
 0x1e3   : > { %v3304_v41 = vadd.f32 %v3303_v60, %v3302_v55  ;;  %v3305_v40 = vpop.f32.mrb[106].mxu1  ;;  %v5009_v19 = vadd.f32 %v3243_v32, %v4911_v2 }
 0x1e4   : > { %v3306_v21 = vpop.f32.mrb[107].mxu1 }
 0x1e5   : > { %v3307_v12 = vadd.f32 %v3306_v21, %v3305_v40  ;;  %v5006_v3 = vadd.f32 %v3304_v41, %v4909_v24  ;;  %v3244_v53 = vpop.f32.mrb[108].mxu0 }
 0x1e6   : > { %v3245_v4 = vpop.f32.mrb[109].mxu0 }
 0x1e7   : > { %v5012_v26 = vadd.f32 %v3307_v12, %v4914_v34  ;;  %v3246_v30 = vadd.f32 %v3245_v4, %v3244_v53  ;;  %v3247_v31 = vpop.f32.mrb[110].mxu0 }
 0x1e8   : > { %v3248_v17 = vpop.f32.mrb[111].mxu0 }
 0x1e9   : > { %v3308_v61 = vpop.f32.mrb[108].mxu1  ;;  %v5018_v39 = vadd.f32 %v3246_v30, %v4920_v47  ;;  %v3249_v2 = vadd.f32 %v3248_v17, %v3247_v31 }
 0x1ea   : > { %v3309_v43 = vpop.f32.mrb[109].mxu1 }
 0x1eb   : > { %v3310_v50 = vadd.f32 %v3309_v43, %v3308_v61  ;;  %v3311_v54 = vpop.f32.mrb[110].mxu1  ;;  %v5025_v7 = vadd.f32 %v3249_v2, %v4925_v20 }
 0x1ec   : > { %v3312_v24 = vpop.f32.mrb[111].mxu1 }
 0x1ed   : > { %v3313_v49 = vadd.f32 %v3312_v24, %v3311_v54  ;;  %v5021_v34 = vadd.f32 %v3310_v50, %v4923_v56  ;;  %v3404_v0 = vpop.f32.mrb[112].mxu0 }
 0x1ee   : > { %v2367_v36 = vadd.f32 %v3404_v0, %v4946_v59  ;;  %v2358_v62 = vpop.f32.mrb[113].mxu0 }
 0x1ef   : > { %v5028_v37 = vadd.f32 %v3313_v49, %v4928_v27  ;;  %v2359_v55 = vadd.f32 %v2358_v62, %v4934_v22  ;;  %v3405_v60 = vpop.f32.mrb[114].mxu0 }
 0x1f0   : > { %2487 = vst [vmem:[%s5032_s8 + $0x10] sm:$0xff] %v2367_v36  ;;  %v2370_v56 = vadd.f32 %v3405_v60, %v4952_v18  ;;  %v2361_v27 = vpop.f32.mrb[115].mxu0  ;;  %v2556_v21 = vmul.f32 %v2367_v36, %v2367_v36 }
 0x1f1   : > { %v3314_v45 = vpop.f32.mrb[112].mxu1  ;;  %2485 = vst [vmem:[%s5032_s8] sm:$0xff] %v2359_v55  ;;  %v2362_v8 = vadd.f32 %v2361_v27, %v4940_v28  ;;  %v2554_v22 = vmul.f32 %v2359_v55, %v2359_v55 }
 0x1f2   : > { %v3315_v9 = vpop.f32.mrb[113].mxu1  ;;  %2488 = vst [vmem:[%s5032_s8 + $0x18] sm:$0xff] %v2370_v56  ;;  %v2557_v61 = vmul.f32 %v2370_v56, %v2370_v56 }
 0x1f3   : > { %v3316_v47 = vadd.f32 %v3315_v9, %v3314_v45  ;;  %v3317_v25 = vpop.f32.mrb[114].mxu1  ;;  %2486 = vst [vmem:[%s5032_s8 + $0x8] sm:$0xff] %v2362_v8  ;;  %v2517_v14 = vadd.f32 %v2362_v8, %v2359_v55  ;;  %v2555_v40 = vmul.f32 %v2362_v8, %v2362_v8 }
 0x1f4   : > { %v3318_v20 = vpop.f32.mrb[115].mxu1 }
 0x1f5   : > { %v3319_v59 = vadd.f32 %v3318_v20, %v3317_v25  ;;  %v5039_v41 = vadd.f32 %v3316_v47, %v4931_v11  ;;  %v2518_v18 = vadd.f32 %v2517_v14, %v2367_v36  ;;  %v2586_v32 = vadd.f32 %v2555_v40, %v2554_v22  ;;  %v3408_v53 = vpop.f32.mrb[116].mxu0 }
 0x1f6   : > { %v2383_v28 = vadd.f32 %v3408_v53, %v4970_v63  ;;  %v2374_v4 = vpop.f32.mrb[117].mxu0 }
 0x1f7   : > { %v5044_v35 = vadd.f32 %v3319_v59, %v4937_v23  ;;  %v2587_v43 = vadd.f32 %v2586_v32, %v2556_v21  ;;  %v2375_v50 = vadd.f32 %v2374_v4, %v4958_v57  ;;  %v2519_v31 = vadd.f32 %v2518_v18, %v2370_v56  ;;  %v3409_v54 = vpop.f32.mrb[118].mxu0 }
 0x1f8   : > { %2491 = vst [vmem:[%s5032_s8 + $0x30] sm:$0xff] %v2383_v28  ;;  %v2386_v17 = vadd.f32 %v3409_v54, %v4976_v13  ;;  %v2377_v2 = vpop.f32.mrb[119].mxu0  ;;  %v2560_v60 = vmul.f32 %v2383_v28, %v2383_v28 }
 0x1f9   : > { %v3320_v12 = vpop.f32.mrb[116].mxu1  ;;  %2489 = vst [vmem:[%s5032_s8 + $0x20] sm:$0xff] %v2375_v50  ;;  %v2520_v49 = vadd.f32 %v2519_v31, %v2375_v50  ;;  %v2558_v45 = vmul.f32 %v2375_v50, %v2375_v50  ;;  %v2588_v63 = vadd.f32 %v2587_v43, %v2557_v61  ;;  %v2378_v36 = vadd.f32 %v2377_v2, %v4964_v16 }
 0x1fa   : > { %v3321_v11 = vpop.f32.mrb[117].mxu1  ;;  %2492 = vst [vmem:[%s5032_s8 + $0x38] sm:$0xff] %v2386_v17  ;;  %v2561_v14 = vmul.f32 %v2386_v17, %v2386_v17 }
 0x1fb   : > { %v3322_v30 = vadd.f32 %v3321_v11, %v3320_v12  ;;  %v3323_v23 = vpop.f32.mrb[118].mxu1  ;;  %v2589_v57 = vadd.f32 %v2588_v63, %v2558_v45  ;;  %2490 = vst [vmem:[%s5032_s8 + $0x28] sm:$0xff] %v2378_v36  ;;  %v2521_v47 = vadd.f32 %v2520_v49, %v2378_v36  ;;  %v2559_v13 = vmul.f32 %v2378_v36, %v2378_v36 }
 0x1fc   : > { %v3324_v24 = vpop.f32.mrb[119].mxu1 }
 0x1fd   : > { %v3325_v0 = vadd.f32 %v3324_v24, %v3323_v23  ;;  %v5054_v9 = vadd.f32 %v3322_v30, %v4943_v38  ;;  %v3412_v25 = vpop.f32.mrb[120].mxu0  ;;  %v2522_v56 = vadd.f32 %v2521_v47, %v2383_v28  ;;  %v2590_v20 = vadd.f32 %v2589_v57, %v2559_v13 }
 0x1fe   : > { %v2399_v27 = vadd.f32 %v3412_v25, %v4994_v51  ;;  %v2390_v59 = vpop.f32.mrb[121].mxu0 }
 0x1ff   : > { %v5057_v62 = vadd.f32 %v3325_v0, %v4949_v46  ;;  %v2391_v8 = vadd.f32 %v2390_v59, %v4982_v42  ;;  %v3413_v46 = vpop.f32.mrb[122].mxu0  ;;  %v2591_v40 = vadd.f32 %v2590_v20, %v2560_v60  ;;  %v2523_v21 = vadd.f32 %v2522_v56, %v2386_v17 }
 0x200   : > { %2495 = vst [vmem:[%s5032_s8 + $0x50] sm:$0xff] %v2399_v27  ;;  %v2402_v18 = vadd.f32 %v3413_v46, %v5000_v29  ;;  %v2393_v12 = vpop.f32.mrb[123].mxu0  ;;  %v2564_v23 = vmul.f32 %v2399_v27, %v2399_v27 }
 0x201   : > { %v3326_v55 = vpop.f32.mrb[120].mxu1  ;;  %2493 = vst [vmem:[%s5032_s8 + $0x40] sm:$0xff] %v2391_v8  ;;  %v2562_v53 = vmul.f32 %v2391_v8, %v2391_v8  ;;  %v2394_v61 = vadd.f32 %v2393_v12, %v4988_v52  ;;  %v2524_v42 = vadd.f32 %v2523_v21, %v2391_v8  ;;  %v2592_v11 = vadd.f32 %v2591_v40, %v2561_v14 }
 0x202   : > { %v3327_v16 = vpop.f32.mrb[121].mxu1  ;;  %2496 = vst [vmem:[%s5032_s8 + $0x58] sm:$0xff] %v2402_v18  ;;  %v2565_v63 = vmul.f32 %v2402_v18, %v2402_v18 }
 0x203   : > { %v3328_v38 = vadd.f32 %v3327_v16, %v3326_v55  ;;  %v3329_v22 = vpop.f32.mrb[122].mxu1  ;;  %2494 = vst [vmem:[%s5032_s8 + $0x48] sm:$0xff] %v2394_v61  ;;  %v2563_v4 = vmul.f32 %v2394_v61, %v2394_v61  ;;  %v2593_v30 = vadd.f32 %v2592_v11, %v2562_v53  ;;  %v2525_v29 = vadd.f32 %v2524_v42, %v2394_v61 }
 0x204   : > { %v3330_v32 = vpop.f32.mrb[123].mxu1 }
 0x205   : > { %v3331_v51 = vadd.f32 %v3330_v32, %v3329_v22  ;;  %v5067_v28 = vadd.f32 %v3328_v38, %v4955_v10  ;;  %v3416_v31 = vpop.f32.mrb[124].mxu0  ;;  %v2526_v54 = vadd.f32 %v2525_v29, %v2399_v27  ;;  %v2594_v52 = vadd.f32 %v2593_v30, %v2563_v4 }
 0x206   : > { %v2415_v10 = vadd.f32 %v3416_v31, %v5021_v34  ;;  %v2406_v24 = vpop.f32.mrb[125].mxu0 }
 0x207   : > { %v5072_v43 = vadd.f32 %v3331_v51, %v4961_v58  ;;  %v2407_v49 = vadd.f32 %v2406_v24, %v5006_v3  ;;  %v3417_v58 = vpop.f32.mrb[126].mxu0  ;;  %v2595_v0 = vadd.f32 %v2594_v52, %v2564_v23  ;;  %v2527_v36 = vadd.f32 %v2526_v54, %v2402_v18 }
 0x208   : > { %2499 = vst [vmem:[%s5032_s8 + $0x70] sm:$0xff] %v2415_v10  ;;  %v2418_v57 = vadd.f32 %v3417_v58, %v5028_v37  ;;  %v2409_v13 = vpop.f32.mrb[127].mxu0  ;;  %v2568_v8 = vmul.f32 %v2415_v10, %v2415_v10 }
 0x209   : > { %v3332_v50 = vpop.f32.mrb[124].mxu1  ;;  %2497 = vst [vmem:[%s5032_s8 + $0x60] sm:$0xff] %v2407_v49  ;;  %v2566_v55 = vmul.f32 %v2407_v49, %v2407_v49  ;;  %v2410_v25 = vadd.f32 %v2409_v13, %v5012_v26  ;;  %v2528_v3 = vadd.f32 %v2527_v36, %v2407_v49  ;;  %v2596_v56 = vadd.f32 %v2595_v0, %v2565_v63 }
 0x20a   : > { %v3333_v17 = vpop.f32.mrb[125].mxu1  ;;  %2500 = vst [vmem:[%s5032_s8 + $0x78] sm:$0xff] %v2418_v57 }
 0x20b   : > { %v3334_v2 = vadd.f32 %v3333_v17, %v3332_v50  ;;  %v3335_v45 = vpop.f32.mrb[126].mxu1  ;;  %2498 = vst [vmem:[%s5032_s8 + $0x68] sm:$0xff] %v2410_v25  ;;  %v2567_v20 = vmul.f32 %v2410_v25, %v2410_v25  ;;  %v2597_v16 = vadd.f32 %v2596_v56, %v2566_v55  ;;  %v2529_v59 = vadd.f32 %v2528_v3, %v2410_v25 }
 0x20c   : > { %v3336_v47 = vpop.f32.mrb[127].mxu1 }
 0x20d   : > { %v3337_v34 = vadd.f32 %v3336_v47, %v3335_v45  ;;  %v2286_v60 = vadd.f32 %v3334_v2, %v4967_v44  ;;  %v3420_v38 = vpop.f32.mrb[128].mxu0  ;;  %v2530_v22 = vadd.f32 %v2529_v59, %v2415_v10  ;;  %v2598_v46 = vadd.f32 %v2597_v16, %v2567_v20 }
 0x20e   : > { %v2431_v26 = vadd.f32 %v3420_v38, %v5054_v9  ;;  %v2422_v44 = vpop.f32.mrb[129].mxu0 }
 0x20f   : > { %v2289_v27 = vadd.f32 %v3337_v34, %v4973_v5  ;;  %v2423_v21 = vadd.f32 %v2422_v44, %v5039_v41  ;;  %v3421_v32 = vpop.f32.mrb[130].mxu0  ;;  %v2569_v5 = vmul.f32 %v2418_v57, %v2418_v57  ;;  %v2599_v12 = vadd.f32 %v2598_v46, %v2568_v8 }
 0x210   : > { %2503 = vst [vmem:[%s5032_s8 + $0x90] sm:$0xff] %v2431_v26  ;;  %v2531_v53 = vadd.f32 %v2530_v22, %v2418_v57  ;;  %v2434_v51 = vadd.f32 %v3421_v32, %v5057_v62  ;;  %v2425_v42 = vpop.f32.mrb[131].mxu0  ;;  %v2572_v10 = vmul.f32 %v2431_v26, %v2431_v26 }
 0x211   : > { %v3338_v37 = vpop.f32.mrb[128].mxu1  ;;  %2501 = vst [vmem:[%s5032_s8 + $0x80] sm:$0xff] %v2423_v21  ;;  %v2570_v11 = vmul.f32 %v2423_v21, %v2423_v21  ;;  %v2426_v4 = vadd.f32 %v2425_v42, %v5044_v35  ;;  %v2600_v29 = vadd.f32 %v2599_v12, %v2569_v5 }
 0x212   : > { %v3339_v14 = vpop.f32.mrb[129].mxu1  ;;  %v2532_v41 = vadd.f32 %v2531_v53, %v2423_v21  ;;  %2504 = vst [vmem:[%s5032_s8 + $0x98] sm:$0xff] %v2434_v51 }
 0x213   : > { %v3340_v40 = vadd.f32 %v3339_v14, %v3338_v37  ;;  %v3341_v18 = vpop.f32.mrb[130].mxu1  ;;  %2502 = vst [vmem:[%s5032_s8 + $0x88] sm:$0xff] %v2426_v4  ;;  %v2571_v50 = vmul.f32 %v2426_v4, %v2426_v4  ;;  %v2601_v23 = vadd.f32 %v2600_v29, %v2570_v11 }
 0x214   : > { %v3342_v61 = vpop.f32.mrb[131].mxu1  ;;  %v2533_v54 = vadd.f32 %v2532_v41, %v2426_v4 }
 0x215   : > { %v3343_v9 = vadd.f32 %v3342_v61, %v3341_v18  ;;  %v2294_v30 = vadd.f32 %v3340_v40, %v4979_v33  ;;  %v3424_v52 = vpop.f32.mrb[132].mxu0  ;;  %v2602_v24 = vadd.f32 %v2601_v23, %v2571_v50 }
 0x216   : > { %v2534_v17 = vadd.f32 %v2533_v54, %v2431_v26  ;;  %v2447_v2 = vadd.f32 %v3424_v52, %v2286_v60  ;;  %v2438_v49 = vpop.f32.mrb[133].mxu0 }
 0x217   : > { %v2297_v31 = vadd.f32 %v3343_v9, %v4985_v6  ;;  %v2439_v45 = vadd.f32 %v2438_v49, %v5067_v28  ;;  %v3425_v63 = vpop.f32.mrb[134].mxu0  ;;  %v2573_v6 = vmul.f32 %v2434_v51, %v2434_v51  ;;  %v2603_v0 = vadd.f32 %v2602_v24, %v2572_v10 }
 0x218   : > { %2507 = vst [vmem:[%s5032_s8 + $0xb0] sm:$0xff] %v2447_v2  ;;  %v2535_v36 = vadd.f32 %v2534_v17, %v2434_v51  ;;  %v2450_v57 = vadd.f32 %v3425_v63, %v2289_v27  ;;  %v2441_v13 = vpop.f32.mrb[135].mxu0  ;;  %v2576_v38 = vmul.f32 %v2447_v2, %v2447_v2 }
 0x219   : > { %v3344_v62 = vpop.f32.mrb[132].mxu1  ;;  %2505 = vst [vmem:[%s5032_s8 + $0xa0] sm:$0xff] %v2439_v45  ;;  %v2574_v55 = vmul.f32 %v2439_v45, %v2439_v45  ;;  %v2442_v25 = vadd.f32 %v2441_v13, %v5072_v43  ;;  %v2604_v28 = vadd.f32 %v2603_v0, %v2573_v6 }
 0x21a   : > { %v3345_v35 = vpop.f32.mrb[133].mxu1  ;;  %v2536_v3 = vadd.f32 %v2535_v36, %v2439_v45  ;;  %2508 = vst [vmem:[%s5032_s8 + $0xb8] sm:$0xff] %v2450_v57  ;;  %v2577_v21 = vmul.f32 %v2450_v57, %v2450_v57 }
 0x21b   : > { %v3346_v33 = vadd.f32 %v3345_v35, %v3344_v62  ;;  %v3347_v58 = vpop.f32.mrb[134].mxu1  ;;  %2506 = vst [vmem:[%s5032_s8 + $0xa8] sm:$0xff] %v2442_v25  ;;  %v2575_v56 = vmul.f32 %v2442_v25, %v2442_v25  ;;  %v2605_v16 = vadd.f32 %v2604_v28, %v2574_v55 }
 0x21c   : > { %v3348_v47 = vpop.f32.mrb[135].mxu1  ;;  %v2537_v59 = vadd.f32 %v2536_v3, %v2442_v25 }
 0x21d   : > { %v3349_v34 = vadd.f32 %v3348_v47, %v3347_v58  ;;  %v2302_v60 = vadd.f32 %v3346_v33, %v4991_v1  ;;  %v3428_v37 = vpop.f32.mrb[136].mxu0  ;;  %v2606_v22 = vadd.f32 %v2605_v16, %v2575_v56 }
 0x21e   : > { %v2538_v8 = vadd.f32 %v2537_v59, %v2447_v2  ;;  %v2454_v26 = vpop.f32.mrb[137].mxu0 }
 0x21f   : > { %v2305_v20 = vadd.f32 %v3349_v34, %v4997_v48  ;;  %v2463_v46 = vadd.f32 %v3428_v37, %v2302_v60  ;;  %v2455_v14 = vadd.f32 %v2454_v26, %v2294_v30  ;;  %v3429_v40 = vpop.f32.mrb[138].mxu0  ;;  %v2607_v48 = vadd.f32 %v2606_v22, %v2576_v38 }
 0x220   : > { %v2539_v18 = vadd.f32 %v2538_v8, %v2450_v57  ;;  %v2457_v12 = vpop.f32.mrb[139].mxu0 }
 0x221   : > { %v3350_v27 = vpop.f32.mrb[136].mxu1  ;;  %2511 = vst [vmem:[%s5032_s8 + $0xd0] sm:$0xff] %v2463_v46  ;;  %v2466_v32 = vadd.f32 %v3429_v40, %v2305_v20  ;;  %2509 = vst [vmem:[%s5032_s8 + $0xc0] sm:$0xff] %v2455_v14  ;;  %v2578_v53 = vmul.f32 %v2455_v14, %v2455_v14  ;;  %v2458_v61 = vadd.f32 %v2457_v12, %v2297_v31 }
 0x222   : > { %v3351_v43 = vpop.f32.mrb[137].mxu1  ;;  %v2540_v11 = vadd.f32 %v2539_v18, %v2455_v14  ;;  %v2608_v9 = vadd.f32 %v2607_v48, %v2577_v21  ;;  %v2580_v54 = vmul.f32 %v2463_v46, %v2463_v46 }
 0x223   : > { %v3352_v1 = vadd.f32 %v3351_v43, %v3350_v27  ;;  %v3353_v44 = vpop.f32.mrb[138].mxu1  ;;  %2512 = vst [vmem:[%s5032_s8 + $0xd8] sm:$0xff] %v2466_v32  ;;  %2510 = vst [vmem:[%s5032_s8 + $0xc8] sm:$0xff] %v2458_v61  ;;  %v2579_v4 = vmul.f32 %v2458_v61, %v2458_v61  ;;  %v2581_v35 = vmul.f32 %v2466_v32, %v2466_v32 }
 0x224   : > { %v3354_v5 = vpop.f32.mrb[139].mxu1  ;;  %v2609_v41 = vadd.f32 %v2608_v9, %v2578_v53  ;;  %v2541_v29 = vadd.f32 %v2540_v11, %v2458_v61 }
 0x225   : > { %v3355_v51 = vadd.f32 %v3354_v5, %v3353_v44  ;;  %v2310_v42 = vadd.f32 %v3352_v1, %v5003_v15  ;;  %v3432_v23 = vpop.f32.mrb[140].mxu0 }
 0x226   : > { %v2542_v62 = vadd.f32 %v2541_v29, %v2463_v46  ;;  %v2610_v52 = vadd.f32 %v2609_v41, %v2579_v4  ;;  %v2470_v31 = vpop.f32.mrb[141].mxu0 }
 0x227   : > { %v2313_v30 = vadd.f32 %v3355_v51, %v5009_v19  ;;  %v2471_v17 = vadd.f32 %v2470_v31, %v2310_v42  ;;  %v3433_v2 = vpop.f32.mrb[142].mxu0 }
 0x228   : > { %v2611_v49 = vadd.f32 %v2610_v52, %v2580_v54  ;;  %v2543_v19 = vadd.f32 %v2542_v62, %v2466_v32  ;;  %v2473_v45 = vpop.f32.mrb[143].mxu0 }
 0x229   : > { %v3356_v50 = vpop.f32.mrb[140].mxu1  ;;  %2513 = vst [vmem:[%s5032_s8 + $0xe0] sm:$0xff] %v2471_v17  ;;  %v2582_v63 = vmul.f32 %v2471_v17, %v2471_v17  ;;  %v2474_v0 = vadd.f32 %v2473_v45, %v2313_v30 }
 0x22a   : > { %v3357_v10 = vpop.f32.mrb[141].mxu1  ;;  %v2544_v36 = vadd.f32 %v2543_v19, %v2471_v17  ;;  %v2612_v57 = vadd.f32 %v2611_v49, %v2581_v35 }
 0x22b   : > { %v3358_v15 = vadd.f32 %v3357_v10, %v3356_v50  ;;  %v3359_v24 = vpop.f32.mrb[142].mxu1  ;;  %2514 = vst [vmem:[%s5032_s8 + $0xe8] sm:$0xff] %v2474_v0  ;;  %v2583_v55 = vmul.f32 %v2474_v0, %v2474_v0 }
 0x22c   : > { %v3360_v33 = vpop.f32.mrb[143].mxu1  ;;  %v2613_v34 = vadd.f32 %v2612_v57, %v2582_v63  ;;  %v2545_v25 = vadd.f32 %v2544_v36, %v2474_v0 }
 0x22d   : > { %v2318_v58 = vadd.f32 %v3358_v15, %v5018_v39  ;;  %v3361_v6 = vadd.f32 %v3360_v33, %v3359_v24 }
 0x22e   : > { %v2614_v3 = vadd.f32 %v2613_v34, %v2583_v55 }
 0x22f   : > { %v2479_v47 = vadd.f32 %v3432_v23, %v2318_v58  ;;  %v2321_v13 = vadd.f32 %v3361_v6, %v5025_v7 }
 0x231   : > { %2515 = vst [vmem:[%s5032_s8 + $0xf0] sm:$0xff] %v2479_v47  ;;  %v2584_v39 = vmul.f32 %v2479_v47, %v2479_v47  ;;  %v2482_v60 = vadd.f32 %v3433_v2, %v2321_v13  ;;  %v2546_v7 = vadd.f32 %v2545_v25, %v2479_v47 }
 0x233   : > { %2516 = vst [vmem:[%s5032_s8 + $0xf8] sm:$0xff] %v2482_v60  ;;  %v2585_v28 = vmul.f32 %v2482_v60, %v2482_v60  ;;  %v2547_v56 = vadd.f32 %v2546_v7, %v2482_v60  ;;  %v2615_v20 = vadd.f32 %v2614_v3, %v2584_v39 }
 0x234   : > { %3612 = shalt.err (!%p3609_p3)
}
 0x235   : > { %s3613_s28 = scalar_lea.hbm %s5117_s13, 4096  ;;  %s3617_s5 = scalar_lea.hbm %s5198_s3, 8192 }
 0x236   : > { %p3614_p4 = scmp.ne.s32.totalorder %s5117_s13, %s3613_s28  ;;  %p3618_p9 = scmp.lt.u32.totalorder %s5117_s13, %s5198_s3 }
 0x237   : > { %p3619_p10 = scmp.lt.u32.totalorder %s3617_s5, %s3613_s28  ;;  %p3621_p12 = scmp.lt.u32.totalorder %s3613_s28, %s5117_s13 }
 0x238   : > { %p3615_p7 = pnand %p3614_p4, %p3762_p5 }
 0x239   : > { %p3620_p11 = por %p3619_p10, %p3618_p9 }
 0x23a   : > { %p3616_p8 = pneg %p3615_p7 }
 0x23b   : > { %p3622_p13 = por %p3621_p12, %p3620_p11 }
 0x23d   : > { %p3623_p0 = pnand %p3622_p13, %p3616_p8 }
 0x23f   : > { %3626 = shalt.err (!%p3623_p0)
}
 0x240   : > { %s3696_s9 = smov 128   ;;  %s3697_s11 = smov 8   ;;  %v2548_v16 = vrot.slane %v2547_v56, 4  ;;  %v2616_v59 = vadd.f32 %v2615_v20, %v2585_v28  ;;  %vm2623_vm6 = vcmask 1040384   ;;  %vm2625_vm7 = vcmask 1041408  }
 0x241   : > { %3451 = dma.vmem_to_hbm [thread:$0]  (%p3762_p5), %s5119_s10, 4096, %s5117_s13, %s2629_s14, %s3696_s9, %s3696_s9, %s3697_s11  }
 0x242   : > { %v2549_v27 = vadd.f32 %v2548_v16, %v2547_v56  ;;  %v2617_v37 = vrot.slane %v2616_v59, 4  ;;  %s2759_s12 = sshll.u32 %s5015_s6, 3  ;;  %s2910_s20 = sshll.u32 %s3745_s19, 7 }
 0x243   : > { %s201_s22 = scalar_lea.vmem [#allocation4], %s2759_s12  ;;  %s5152_s14 = scalar_lea.hbm %s5199_s4, %s2910_s20 }
 0x244   : > { %v2550_v38 = vrot.slane %v2549_v27, 2  ;;  %v2618_v8 = vadd.f32 %v2617_v37, %v2616_v59  ;;  %s2663_s23 = sshll.u32 %s201_s22, 4  ;;  %s2634_s27 = scalar_lea.sflag [#allocation5], %s5015_s6  ;;  %s5154_s23 = int_to_ptr.vmem [resolvable:$true] %s2663_s23 }
 0x245   : > { %s3627_s19 = scalar_lea.vmem %s5154_s23, 128  ;;  %s3698_s28 = smov [#allocation4]  }
 0x246   : > { %v2551_v22 = vadd.f32 %v2550_v38, %v2549_v27  ;;  %v2619_v46 = vrot.slane %v2618_v8, 2  ;;  %p3628_p1 = scmp.ne.s32.totalorder %s5154_s23, %s3627_s19  ;;  %s3631_s29 = sshll.u32 %s3698_s28, 4  ;;  %s3632_s29 = int_to_ptr.vmem [resolvable:$false] %s3631_s29 }
 0x247   : > { %s3633_s30 = scalar_lea.vmem %s3632_s29, 256  ;;  %p3634_p4 = scmp.lt.s32.totalorder %s5154_s23, %s3632_s29 }
 0x248   : > { %v2552_v43 = vrot.slane %v2551_v22, 1  ;;  %v2620_v26 = vadd.f32 %v2619_v46, %v2618_v8  ;;  %p3629_p2 = pnand %p3628_p1, %p3762_p5  ;;  %p3635_p7 = scmp.lt.s32.totalorder %s3633_s30, %s3627_s19 }
 0x24a   : > { %v2621_v1 = vrot.slane %v2620_v26, 1  ;;  %v2553_v14 = vadd.f32 %v2552_v43, %v2551_v22  ;;  %p3630_p3 = pneg %p3629_p2  ;;  %p3636_p8 = por %p3635_p7, %p3634_p4 }
 0x24c   : > { %v2622_v44 = vadd.f32 %v2621_v1, %v2620_v26  ;;  %p3637_p9 = pnand %p3636_p8, %p3630_p3 }
 0x24e   : > { %v2624_v40 = vsel %vm2623_vm6, %v2553_v14, %v2622_v44 }
 0x24f   : > { %v2626_v21 = vsel %vm2625_vm7, %v2624_v40, 0.0 }
 0x250   : > { %2627 = vst [vmem:[%s201_s22] sm:$0xff] %v2626_v21 }
 0x251   : > { %3640 = shalt.err (!%p3637_p9)
}
 0x252   : > { %s3641_s6 = scalar_lea.hbm %s5152_s14, 128  ;;  %s3645_s8 = scalar_lea.hbm %s5199_s4, 256 }
 0x253   : > { %p3642_p10 = scmp.ne.s32.totalorder %s5152_s14, %s3641_s6  ;;  %p3646_p13 = scmp.lt.u32.totalorder %s5152_s14, %s5199_s4 }
 0x254   : > { %p3647_p0 = scmp.lt.u32.totalorder %s3645_s8, %s3641_s6  ;;  %p3649_p2 = scmp.lt.u32.totalorder %s3641_s6, %s5152_s14 }
 0x255   : > { %p3643_p11 = pnand %p3642_p10, %p3762_p5 }
 0x256   : > { %p3648_p1 = por %p3647_p0, %p3646_p13 }
 0x257   : > { %p3644_p12 = pneg %p3643_p11 }
 0x258   : > { %p3650_p3 = por %p3649_p2, %p3648_p1 }
 0x25a   : > { %p3651_p4 = pnand %p3650_p3, %p3644_p12 }
 0x25c   : > { %3654 = shalt.err (!%p3651_p4)
}
 0x25d   : > { %3452 = dma.vmem_to_hbm [thread:$0]  (%p3762_p5), %s5154_s23, 128, %s5152_s14, %s2634_s27  }
 0x25e PF: > { %p3462_p7 = scmp.ge.s32.totalorder %s3693_s18, 2  ;;  %s2675_s12 = sand.u32 1, %s3681_s15  }
 0x25f   : > { %s2676_s20 = scalar_lea.sflag [#allocation3], %s2675_s12 }
 0x260   : > { %p3456_p8 = pnand %p3462_p7, %p3766_p6 }
 0x262   : > { %3672 = dma.done.wait (!%p3456_p8), %s2676_s20, 4096  }
 0x263   : > { %3674 = vsyncadd (!%p3456_p8), %s2676_s20, 4294963200  ;;  %s2685_s22 = scalar_lea.sflag [#allocation5], %s2675_s12 }
 0x264   : > { %3676 = dma.done.wait (!%p3456_p8), %s2685_s22, 128  }
 0x265   : > { %3678 = vsyncadd (!%p3456_p8), %s2685_s22, 4294967168  ;;  %p18_p5 = scmp.ge.s32.totalorder %s3749_s21, 4   ;;  %s5231_s15 = smov %s3685_s16 }
 0x266   : > { %s5232_s16 = smov %s3689_s17  ;;  %s5233_s17 = smov %s3760_s24 }
 0x267   : > { %s5234_s18 = smov %s3749_s21  ;;  %20 = sbr.rel (!%p18_p5) target bundleno = 5 (0x5), region = 84 }
 0x26e   :  { %2690 = vsyncpa [#allocation3], 1 }
 0x26f   :  { %2692 = vsyncpa [#allocation3 + $0x1], 1 }
 0x270   :  { %2693 = vsyncpa [#allocation5], 1 }
 0x271   :  { %2695 = vsyncpa [#allocation5 + $0x1], 1 }

</bundles_post_ra>
